<compile_context>
chip_gen: v5e
topology: v5e:2x2
jax: 0.10.0
libtpu: 0.0.40
codegen_flags: <defaults>
</compile_context>

<pallas_src>
import functools

import jax
import jax.numpy as jnp
from jax.experimental import pallas as pl
from jax.experimental.pallas import tpu as pltpu


def _round_up(x, m):
    return ((x + m - 1) // m) * m


def _cdiv(a, b):
    return -(-a // b)


_VMEM_BUDGET = 40 * 1024 * 1024   # per-step working-set target (sized for v7x: 64 MiB phys)
_VMEM_LIMIT = 48 * 1024 * 1024    # scoped-VMEM cap handed to Mosaic (< v7x phys, > v5e/v6e defaults)


def _temporal_conv_kernel(x_ref, w_ref, b_ref, out_ref, *, kt, cp_pad, act_func):
    """One (batch_block, V-chunk) step of the gated causal temporal conv.

    x_ref:   (bb, T, vv, c_in)        activations, native dtype (f32/bf16, no upcast)
    w_ref:   (kt, c_in, 2*cp_pad)     conv weights, Align residual folded into tap kt-1;
                                      p-gate in lanes [0:c_out], q-gate in [cp_pad:cp_pad+c_out]
    b_ref:   (1, 2*cp_pad)            f32 bias, same lane layout
    out_ref: (bb, T_out, vv, cp_pad)  gated output; only lanes [0:c_out] are meaningful
    """
    bb, t_full, vv, c_in = x_ref.shape
    t_out = t_full - kt + 1
    m = bb * t_out * vv

    x = x_ref[...]                                       # native dtype straight to the MXU

    # Causal temporal conv == kt accumulating (m, c_in) @ (c_in, 2*cp_pad) MXU matmuls
    # (no im2col concat).  vv is a multiple of 8, so the leading-dim merge is a view.
    acc = jnp.dot(x[:, 0:t_out].reshape(m, c_in), w_ref[0],
                  preferred_element_type=jnp.float32)
    for k in range(1, kt):
        acc = acc + jnp.dot(x[:, k:k + t_out].reshape(m, c_in), w_ref[k],
                            preferred_element_type=jnp.float32)
    acc = acc + b_ref[...]                               # (1, 2*cp_pad) broadcast over rows

    # Gate halves sit on a 128-multiple lane boundary, so both slices are whole-vreg
    # views (no roll, no masked select).  The Align residual is already folded into p.
    p = acc[:, :cp_pad]
    q = acc[:, cp_pad:]
    sig_q = 1.0 / (1.0 + jnp.exp(-q))                    # exp on the EUP
    if act_func == "glu":
        gated = p * sig_q
    elif act_func == "gtu":
        gated = jnp.tanh(p) * sig_q
    else:
        raise ValueError(f"ERROR: activation function {act_func} is not defined.")

    # Lane-dense store: last dim cp_pad is a multiple of 128 (unmasked vst).
    out_ref[...] = gated.reshape(bb, t_out, vv, cp_pad).astype(out_ref.dtype)


def _fold_params(params, *, kt, c_in, c_out, cp_pad, dtype):
    """Fold the Align residual into the conv weights/bias; pack gates onto padded lanes."""
    w = params["conv_w"].astype(jnp.float32)             # (kt, c_in, 2*c_out)
    b = params["conv_b"].astype(jnp.float32)             # (2*c_out,)

    # Residual projection A (c_in, c_out): 1x1-conv weights if c_in > c_out,
    # otherwise identity (zero-padded on extra output channels).
    if c_in > c_out:
        a_w = params["align_w"].astype(jnp.float32)
        a_b = params["align_b"].astype(jnp.float32)
    else:
        a_w = jnp.eye(c_in, c_out, dtype=jnp.float32)
        a_b = jnp.zeros((c_out,), jnp.float32)

    # x_in uses x at input time t + kt - 1  ==  temporal tap k = kt-1, p-gate only.
    w = w.at[kt - 1, :, :c_out].add(a_w)
    b = b.at[:c_out].add(a_b)

    # Pack: p -> lanes [0:c_out], q -> lanes [cp_pad:cp_pad+c_out], zeros elsewhere.
    n2 = 2 * cp_pad
    w_pad = jnp.zeros((kt, c_in, n2), jnp.float32)
    w_pad = w_pad.at[:, :, :c_out].set(w[:, :, :c_out])
    w_pad = w_pad.at[:, :, cp_pad:cp_pad + c_out].set(w[:, :, c_out:])
    b_pad = jnp.zeros((n2,), jnp.float32)
    b_pad = b_pad.at[:c_out].set(b[:c_out])
    b_pad = b_pad.at[cp_pad:cp_pad + c_out].set(b[c_out:])
    return w_pad.astype(dtype), b_pad.reshape(1, n2)     # bias stays f32 (added to f32 acc)


def _choose_blocks(B, T, V, c_in, cp_pad, kt, dbytes,
                   batch_block=None, v_block=None, vmem_budget=_VMEM_BUDGET):
    """Pick (batch_block, v_block, padded V) so one grid step's working set fits VMEM.

    Working set per step = double-buffered input/output blocks + live f32 gating
    temporaries.  The x block costs bb*T*vv*round_up(c_in,128)*dbytes in VMEM (last dim
    pads to 128 lanes), not bb*T*vv*c_in.  The 40 MiB budget targets v7x's 64 MiB
    physical VMEM; v5e/v6e (128 MiB) simply get extra headroom.
    """
    t_out = T - kt + 1
    lane_cin = _round_up(c_in, 128)
    v8 = _round_up(V, 8)

    def cost(bb, vv):
        x_blk = bb * T * vv * lane_cin * dbytes
        o_blk = bb * t_out * vv * cp_pad * dbytes
        f32_tmp = 3 * bb * t_out * vv * (2 * cp_pad) * 4     # acc + gating temporaries
        return 2 * (x_blk + o_blk) + f32_tmp

    # V chunk size (multiple of 8; bounds both the input block and the temporaries).
    if v_block is not None:
        vv = min(max(8, _round_up(v_block, 8)), v8)
    else:
        vv, splits = v8, 1
        while cost(1, vv) > vmem_budget and vv > 8:
            splits *= 2
            vv = max(8, _round_up(_cdiv(v8, splits), 8))
    nv = _cdiv(v8, vv)

    # Batch block: grow to amortize the ~0.35 us per-grid-step overhead while staying in
    # budget, but keep >= 2 grid steps so both v7x TensorCores get work.
    if batch_block is not None:
        bb = batch_block
    else:
        bb = 1
        while (bb * 2 <= B and B % (bb * 2) == 0
               and cost(bb * 2, vv) <= vmem_budget
               and bb * T * vv * lane_cin * dbytes < (1 << 20)):
            bb *= 2
        if (B // bb) * nv < 2 and bb > 1:
            bb //= 2
    if v_block is None and (B // bb) * nv < 2 and v8 > 8:
        vv = max(8, _round_up(_cdiv(v8, 2), 8))
        nv = _cdiv(v8, vv)

    return bb, vv, nv * vv


def temporal_conv_layer_nhwc(x_nhwc, params, *, kt, c_in, c_out, act_func,
                             batch_block=None, v_block=None, compute_dtype=None):
    """Channels-last entry point: (B, T, V, c_in) -> (B, T-kt+1, V, c_out).

    Preferred API: keep the whole STGCN stack channels-last between layers and call this
    directly -- it has NO layout transposes, so the per-layer full-tensor HBM round trips
    of the NCHW wrapper disappear.
    """
    B, T, V, C = x_nhwc.shape
    assert C == c_in
    assert T >= kt
    assert act_func in ("glu", "gtu")
    t_out = T - kt + 1
    dtype = compute_dtype if compute_dtype is not None else x_nhwc.dtype
    dbytes = jnp.dtype(dtype).itemsize

    cp_pad = _round_up(c_out, 128)            # lane-dense output/gate width (only c_out stored back logically)
    n2 = 2 * cp_pad

    bb, vv, v_pad = _choose_blocks(B, T, V, c_in, cp_pad, kt, dbytes,
                                   batch_block=batch_block, v_block=v_block)
    assert B % bb == 0, "batch_block must divide B"

    x = x_nhwc.astype(dtype)
    if v_pad != V:
        # Pad V so the V block is a multiple of 8: per-tap slice+reshape stays a
        # copy-free view of the (8,128)-tiled activations, and stores stay dense.
        x = jnp.pad(x, ((0, 0), (0, 0), (0, v_pad - V), (0, 0)))

    w_pad, b_pad = _fold_params(params, kt=kt, c_in=c_in, c_out=c_out,
                                cp_pad=cp_pad, dtype=dtype)

    grid = (B // bb, v_pad // vv)
    kernel = functools.partial(_temporal_conv_kernel, kt=kt, cp_pad=cp_pad,
                               act_func=act_func)

    cost = pl.CostEstimate(
        flops=2 * B * t_out * V * c_in * (2 * c_out) * kt,
        transcendentals=B * t_out * V * c_out * (2 if act_func == "gtu" else 1),
        bytes_accessed=(x.size * dbytes
                        + B * t_out * v_pad * cp_pad * dbytes
                        + w_pad.size * dbytes + b_pad.size * 4),
    )

    out = pl.pallas_call(
        kernel,
        out_shape=jax.ShapeDtypeStruct((B, t_out, v_pad, cp_pad), dtype),
        grid=grid,
        in_specs=[
            pl.BlockSpec((bb, T, vv, c_in), lambda i, j: (i, 0, j, 0)),
            pl.BlockSpec((kt, c_in, n2), lambda i, j: (0, 0, 0)),
            pl.BlockSpec((1, n2), lambda i, j: (0, 0)),
        ],
        out_specs=pl.BlockSpec((bb, t_out, vv, cp_pad), lambda i, j: (i, 0, j, 0)),
        compiler_params=pltpu.CompilerParams(
            dimension_semantics=("parallel", "parallel"),
            vmem_limit_bytes=_VMEM_LIMIT,
        ),
        cost_estimate=cost,
    )(x, w_pad, b_pad)

    # Drop the V padding and the gate/lane padding.  This is a no-op when V % 8 == 0 and
    # c_out % 128 == 0; otherwise it is the unavoidable cost of the exact logical shape.
    return out[:, :, :V, :c_out]


def temporal_conv_layer(x_nchw, params, *, kt, c_in, c_out, act_func,
                        batch_block=None, v_block=None, compute_dtype=None):
    """PyTorch-contract entry point: (B, c_in, T, V) -> (B, c_out, T-kt+1, V).

    TODO(synk): the two boundary transposes below are each a full-tensor HBM round trip
    (comparable to the kernel's own traffic); keep the surrounding STGCN stack
    channels-last and call temporal_conv_layer_nhwc directly to eliminate them.
    """
    B, C, T, V = x_nchw.shape
    assert C == c_in
    x = jnp.transpose(x_nchw, (0, 2, 3, 1))              # NCHW -> (B, T, V, c_in)
    out = temporal_conv_layer_nhwc(x, params, kt=kt, c_in=c_in, c_out=c_out,
                                   act_func=act_func, batch_block=batch_block,
                                   v_block=v_block, compute_dtype=compute_dtype)
    return jnp.transpose(out, (0, 3, 1, 2)).astype(x_nchw.dtype)   # back to NCHW


def temporal_conv_layer_ref(x_nchw, params, *, kt, c_in, c_out, act_func):
    """Pure-JAX reference (explicit Align + causal conv), for correctness checking."""
    B, C, T, V = x_nchw.shape
    T_out = T - kt + 1
    x = jnp.transpose(x_nchw, (0, 2, 3, 1)).astype(jnp.float32)   # (B, T, V, c_in)

    w = params["conv_w"].astype(jnp.float32)                      # (kt, c_in, 2*c_out)
    y = jnp.zeros((B, T_out, V, 2 * c_out), jnp.float32)
    for k in range(kt):
        y = y + jnp.einsum("btvc,co->btvo", x[:, k:k + T_out], w[k])
    y = y + params["conv_b"].astype(jnp.float32)

    if c_in > c_out:
        x_al = jnp.einsum("btvc,co->btvo", x, params["align_w"]) + params["align_b"]
    elif c_in < c_out:
        x_al = jnp.concatenate([x, jnp.zeros((B, T, V, c_out - c_in), jnp.float32)], axis=-1)
    else:
        x_al = x
    x_in = x_al[:, kt - 1:]

    x_p, x_q = y[..., :c_out], y[..., c_out:]
    if act_func == "glu":
        out = (x_p + x_in) * jax.nn.sigmoid(x_q)
    else:
        out = jnp.tanh(x_p + x_in) * jax.nn.sigmoid(x_q)
    return jnp.transpose(out, (0, 3, 1, 2))


if __name__ == "__main__":
    def run_case(name, *, B, c_in, c_out, T, V, kt, act_func, compute_dtype, atol,
                 batch_block=None, v_block=None):
        key = jax.random.PRNGKey(0)
        k1, k2, k3, k4, k5 = jax.random.split(key, 5)
        x = jax.random.normal(k1, (B, c_in, T, V), jnp.float32)
        params = {
            "conv_w": 0.1 * jax.random.normal(k2, (kt, c_in, 2 * c_out), jnp.float32),
            "conv_b": 0.1 * jax.random.normal(k3, (2 * c_out,), jnp.float32),
            "align_w": 0.1 * jax.random.normal(k4, (c_in, c_out), jnp.float32),
            "align_b": 0.1 * jax.random.normal(k5, (c_out,), jnp.float32),
        }
        out = temporal_conv_layer(x, params, kt=kt, c_in=c_in, c_out=c_out,
                                  act_func=act_func, compute_dtype=compute_dtype,
                                  batch_block=batch_block, v_block=v_block)
        out = jax.block_until_ready(out)
        ref = temporal_conv_layer_ref(x, params, kt=kt, c_in=c_in, c_out=c_out,
                                      act_func=act_func)
        assert out.shape == (B, c_out, T - kt + 1, V), (name, out.shape)
        err = float(jnp.max(jnp.abs(out.astype(jnp.float32) - ref)))
        assert err <= atol, (name, err)

    # c_in < c_out (identity/zero-pad Align folded), GLU, f32
    run_case("glu_f32", B=2, c_in=4, c_out=8, T=12, V=16, kt=3,
             act_func="glu", compute_dtype=jnp.float32, atol=1e-4)
    # GTU activation branch
    run_case("gtu_f32", B=2, c_in=4, c_out=8, T=12, V=16, kt=3,
             act_func="gtu", compute_dtype=jnp.float32, atol=1e-4)
    # c_in > c_out (1x1-conv Align folded into the weights), GLU, f32
    run_case("glu_align_f32", B=2, c_in=8, c_out=4, T=12, V=16, kt=3,
             act_func="glu", compute_dtype=jnp.float32, atol=1e-4)
    # V not a multiple of 8 + explicit V-blocking (exercises padding and the V grid axis)
    run_case("glu_f32_vblock", B=1, c_in=4, c_out=8, T=12, V=20, kt=3,
             act_func="glu", compute_dtype=jnp.float32, atol=1e-4, v_block=8)
    # bf16 activation/weight path (f32 MXU accumulation); loose tolerance for bf16
    run_case("glu_bf16", B=2, c_in=4, c_out=8, T=12, V=16, kt=3,
             act_func="glu", compute_dtype=jnp.bfloat16, atol=1e-1)

    print("KERNEL_OK")
</pallas_src>

<mosaic_0001>
module attributes {stable_mosaic.version = 11 : i64} {
  func.func @_temporal_conv_kernel(%arg0: i32, %arg1: i32, %arg2: memref<1x12x16x4xf32, #tpu.memory_space<vmem>>, %arg3: memref<3x4x256xf32, #tpu.memory_space<vmem>>, %arg4: memref<1x256xf32, #tpu.memory_space<vmem>>, %arg5: memref<1x10x16x128xf32, #tpu.memory_space<vmem>>) attributes {dimension_semantics = [#tpu.dimension_semantics<parallel>, #tpu.dimension_semantics<parallel>], iteration_bounds = array<i64: 2, 1>, scalar_prefetch = 0 : i64, scratch_operands = 0 : i64, tpu.core_type = #tpu.core_type<tc>, window_params = [{transform_indices = @transform_0, window_bounds = array<i64: 1, 12, 16, 4>}, {pipeline_mode = #tpu.pipeline_mode<synchronous>, transform_indices = @transform_1, window_bounds = array<i64: 3, 4, 256>}, {pipeline_mode = #tpu.pipeline_mode<synchronous>, transform_indices = @transform_2, window_bounds = array<i64: 1, 256>}, {transform_indices = @transform_3, window_bounds = array<i64: 1, 10, 16, 128>}]} {
    %c0 = arith.constant 0 : index
    %c0_0 = arith.constant 0 : index
    %c0_1 = arith.constant 0 : index
    %c0_2 = arith.constant 0 : index
    %0 = vector.load %arg2[%c0, %c0_0, %c0_1, %c0_2] : memref<1x12x16x4xf32, #tpu.memory_space<vmem>>, vector<1x12x16x4xf32>
    %1 = vector.extract_strided_slice %0 {offsets = [0, 0, 0, 0], sizes = [1, 10, 16, 4], strides = [1, 1, 1, 1]} : vector<1x12x16x4xf32> to vector<1x10x16x4xf32>
    %2 = vector.shape_cast %1 : vector<1x10x16x4xf32> to vector<160x4xf32>
    %c0_3 = arith.constant 0 : index
    %c0_4 = arith.constant 0 : index
    %c0_5 = arith.constant 0 : index
    %3 = vector.load %arg3[%c0_3, %c0_4, %c0_5] : memref<3x4x256xf32, #tpu.memory_space<vmem>>, vector<1x4x256xf32>
    %4 = vector.shape_cast %3 : vector<1x4x256xf32> to vector<4x256xf32>
    %cst = arith.constant dense<0.000000e+00> : vector<160x256xf32>
    %5 = tpu.matmul %2, %4, %cst {dimension_numbers = #tpu.dot_dimension_numbers<[1], [0], [0], [1], [0, 0, 1, 1], [], []>} : vector<160x4xf32>, vector<4x256xf32>, vector<160x256xf32> -> vector<160x256xf32>
    %6 = vector.extract_strided_slice %0 {offsets = [0, 1, 0, 0], sizes = [1, 10, 16, 4], strides = [1, 1, 1, 1]} : vector<1x12x16x4xf32> to vector<1x10x16x4xf32>
    %7 = vector.shape_cast %6 : vector<1x10x16x4xf32> to vector<160x4xf32>
    %c1 = arith.constant 1 : index
    %c0_6 = arith.constant 0 : index
    %c0_7 = arith.constant 0 : index
    %8 = vector.load %arg3[%c1, %c0_6, %c0_7] : memref<3x4x256xf32, #tpu.memory_space<vmem>>, vector<1x4x256xf32>
    %9 = vector.shape_cast %8 : vector<1x4x256xf32> to vector<4x256xf32>
    %cst_8 = arith.constant dense<0.000000e+00> : vector<160x256xf32>
    %10 = tpu.matmul %7, %9, %cst_8 {dimension_numbers = #tpu.dot_dimension_numbers<[1], [0], [0], [1], [0, 0, 1, 1], [], []>} : vector<160x4xf32>, vector<4x256xf32>, vector<160x256xf32> -> vector<160x256xf32>
    %11 = arith.addf %5, %10 : vector<160x256xf32>
    %12 = vector.extract_strided_slice %0 {offsets = [0, 2, 0, 0], sizes = [1, 10, 16, 4], strides = [1, 1, 1, 1]} : vector<1x12x16x4xf32> to vector<1x10x16x4xf32>
    %13 = vector.shape_cast %12 : vector<1x10x16x4xf32> to vector<160x4xf32>
    %c2 = arith.constant 2 : index
    %c0_9 = arith.constant 0 : index
    %c0_10 = arith.constant 0 : index
    %14 = vector.load %arg3[%c2, %c0_9, %c0_10] : memref<3x4x256xf32, #tpu.memory_space<vmem>>, vector<1x4x256xf32>
    %15 = vector.shape_cast %14 : vector<1x4x256xf32> to vector<4x256xf32>
    %cst_11 = arith.constant dense<0.000000e+00> : vector<160x256xf32>
    %16 = tpu.matmul %13, %15, %cst_11 {dimension_numbers = #tpu.dot_dimension_numbers<[1], [0], [0], [1], [0, 0, 1, 1], [], []>} : vector<160x4xf32>, vector<4x256xf32>, vector<160x256xf32> -> vector<160x256xf32>
    %17 = arith.addf %11, %16 : vector<160x256xf32>
    %c0_12 = arith.constant 0 : index
    %c0_13 = arith.constant 0 : index
    %18 = vector.load %arg4[%c0_12, %c0_13] : memref<1x256xf32, #tpu.memory_space<vmem>>, vector<1x256xf32>
    %19 = vector.broadcast %18 : vector<1x256xf32> to vector<160x256xf32>
    %20 = arith.addf %17, %19 : vector<160x256xf32>
    %21 = vector.extract_strided_slice %20 {offsets = [0, 0], sizes = [160, 128], strides = [1, 1]} : vector<160x256xf32> to vector<160x128xf32>
    %22 = vector.extract_strided_slice %20 {offsets = [0, 128], sizes = [160, 128], strides = [1, 1]} : vector<160x256xf32> to vector<160x128xf32>
    %cst_14 = arith.constant 0.000000e+00 : f32
    %23 = vector.broadcast %cst_14 : f32 to vector<160x128xf32>
    %24 = arith.subf %23, %22 : vector<160x128xf32>
    %25 = math.exp %24 : vector<160x128xf32>
    %cst_15 = arith.constant 1.000000e+00 : f32
    %26 = vector.broadcast %cst_15 : f32 to vector<160x128xf32>
    %27 = arith.addf %26, %25 : vector<160x128xf32>
    %cst_16 = arith.constant 1.000000e+00 : f32
    %28 = vector.broadcast %cst_16 : f32 to vector<160x128xf32>
    %29 = arith.divf %28, %27 : vector<160x128xf32>
    %30 = arith.mulf %21, %29 : vector<160x128xf32>
    %31 = vector.shape_cast %30 : vector<160x128xf32> to vector<1x10x16x128xf32>
    %c0_17 = arith.constant 0 : index
    %c0_18 = arith.constant 0 : index
    %c0_19 = arith.constant 0 : index
    %c0_20 = arith.constant 0 : index
    %32 = vector.load %arg5[%c0_17, %c0_18, %c0_19, %c0_20] : memref<1x10x16x128xf32, #tpu.memory_space<vmem>>, vector<1x10x16x128xf32>
    tpu.vector_store %arg5[%c0_17, %c0_18, %c0_19, %c0_20], %31 {strides = array<i32>} : memref<1x10x16x128xf32, #tpu.memory_space<vmem>>, vector<1x10x16x128xf32>,
    return
  }
  func.func @transform_0(%arg0: i32, %arg1: i32) -> (i32, i32, i32, i32) {
    %c0_i32 = arith.constant 0 : i32
    %c0_i32_0 = arith.constant 0 : i32
    %c0_i32_1 = arith.constant 0 : i32
    return %arg0, %c0_i32, %arg1, %c0_i32_0 : i32, i32, i32, i32
  }
  func.func @transform_1(%arg0: i32, %arg1: i32) -> (i32, i32, i32) {
    %c0_i32 = arith.constant 0 : i32
    %c0_i32_0 = arith.constant 0 : i32
    %c0_i32_1 = arith.constant 0 : i32
    %c0_i32_2 = arith.constant 0 : i32
    return %c0_i32, %c0_i32_0, %c0_i32_1 : i32, i32, i32
  }
  func.func @transform_2(%arg0: i32, %arg1: i32) -> (i32, i32) {
    %c0_i32 = arith.constant 0 : i32
    %c0_i32_0 = arith.constant 0 : i32
    %c0_i32_1 = arith.constant 0 : i32
    return %c0_i32, %c0_i32_0 : i32, i32
  }
  func.func @transform_3(%arg0: i32, %arg1: i32) -> (i32, i32, i32, i32) {
    %c0_i32 = arith.constant 0 : i32
    %c0_i32_0 = arith.constant 0 : i32
    %c0_i32_1 = arith.constant 0 : i32
    return %arg0, %c0_i32, %arg1, %c0_i32_0 : i32, i32, i32, i32
  }
}

</mosaic_0001>

<bundles_post_ra>
// kernel: tpu_custom_call.1
= control target key start
LH: loop header
LB: loop body
LE: loop exit
PB: predicated region body
PF: predicated region fallthrough
CT: control target
= control target key end

     0   :  { %8 = vsyncpa [#allocation3], 0  ;;  %s2546_s0 = inlined_call_operand.vmem [shape: f32[2,12,16,4], index: 0, kind: input, shape index: {}]   ;;  %s2547_s1 = inlined_call_operand.vmem [shape: f32[3,4,256], index: 1, kind: input, shape index: {}]   ;;  %s2548_s2 = inlined_call_operand.vmem [shape: f32[1,256], index: 2, kind: input, shape index: {}]   ;;  %s2549_s3 = inlined_call_operand.hbm [shape: f32[2,10,16,128], index: 3, kind: output, shape index: {}]  }
   0x1   :  { %10 = vsyncpa [#allocation3 + $0x1], 0  ;;  %s1773_s12 = smov 0   ;;  %s1775_s13 = smov 0  }
   0x2   :  { %s1777_s14 = smov 0   ;;  %s1779_s15 = smov 0  }
   0x3   :  { %s1781_s16 = smov 0   ;;  %s1783_s17 = smov 0  }
   0x4 LB: > { %s1392_s18 = sadd.s32 4294967295, %s1749_s17   ;;  %s1393_s19 = sadd.s32 4294967294, %s1749_s17   ;;  %s1749_s17 = sphi %s1783_s17, %s16_s17   ;;  %s1745_s16 = sphi %s1781_s16, %s2564_s16   ;;  %s1741_s15 = sphi %s1779_s15, %s2563_s15   ;;  %s1737_s14 = sphi %s1777_s14, %s2562_s14   ;;  %s1733_s13 = sphi %s1775_s13, %s2561_s13   ;;  %s1729_s12 = sphi %s1773_s12, %s2560_s12  }
   0x5   : > { %s28_s20 = sadd.s32 1, %s1745_s16  ;;  %s107_s21 = sadd.s32 1, %s1737_s14 }
   0x6   : > { %p30_p0 = scmp.ge.s32.totalorder %s28_s20, 2  ;;  %p117_p1 = scmp.ne.s32.totalorder %s1737_s14, %s1733_s13 }
   0x7   : > { %p118_p2 = scmp.eq.s32.totalorder %s1392_s18, 1  ;;  %p123_p3 = scmp.ne.s32.totalorder %s1733_s13, %s1729_s12 }
   0x8   : > { %s2566_s20 = smov (%p30_p0, %s28_s20), 0  ;;  %p124_p5 = scmp.eq.s32.totalorder %s1393_s19, 1 }
   0x9   : > { %p1813_p4 = por %p118_p2, %p117_p1  ;;  %s102_s23 = ssub.s32 %s1745_s16, %s2566_s20 }
   0xa   : > { %p1396_p6 = scmp.ge.s32.totalorder %s1749_s17, 1  ;;  %p105_p7 = scmp.eq.s32.totalorder %s102_s23, 0 }
   0xb   : > { %p1820_p8 = por %p124_p5, %p123_p3  ;;  %p161_p9 = scmp.lt.s32.totalorder %s1749_s17, 3 }
   0xc   : > { %s1826_s25 = scalar_select %p105_p7, %s1737_s14, %s107_s21  }
   0xd   : > { %p162_p10 = pnand %p1396_p6, %p161_p9 }
   0xf   : > { %165 = sbr.rel (%p162_p10) target bundleno = 436 (0x1b4), region = 32 }
  0x14   : > { %v1398_v0 = vld [vmem:[%s2547_s1 + $0x8] sm:$0xff]  ;;  %p190_p11 = scmp.lt.s32.totalorder %s1741_s15, 1  ;;  %vm292_vm0 = vcmask 1043456   ;;  %v224_v1 = vld [vmem:[%s2547_s1] sm:$0xff]  ;;  %vm231_vm1 = vcmask 31744   ;;  %v1483_v6 = vld [vmem:[%s2547_s1 + $0x10] sm:$0xff] }
  0x15   : > { %228 = vst [vmem:[#allocation1] ss:$2 sm:$0xff] %v1398_v0  ;;  %s186_s18 = sand.u32 1, %s1733_s13   ;;  %s1533_s23 = smul.u32 160, %s1741_s15 }
  0x16   : > { %s191_s28 = scalar_select %p190_p11, %s1741_s15, 1 }
  0x17   : > { %s1531_s19 = smul.u32 160, %s186_s18  ;;  %s1296_s30 = scalar_lea.sflag [#allocation3], %s186_s18 }
  0x18   : > { %s1532_s29 = smul.u32 192, %s191_s28  ;;  %s1309_s28 = scalar_lea.hbm %s2549_s3, %s1533_s23 }
  0x19   : > { %s2278_s21 = scalar_lea.vmem [#allocation2], %s1531_s19  ;;  %s1691_s8 = scalar_lea.hbm %s2549_s3, 320 }
  0x1a   : > { %s1839_s7 = scalar_lea.vmem %s2546_s0, %s1532_s29  ;;  %s1310_s15 = sshll.u32 %s2278_s21, 4  ;;  %s1311_s15 = int_to_ptr.vmem [resolvable:$true] %s1310_s15 }
  0x1b   : > { %v1842_v2 = vld [vmem:[%s1839_s7 + $0x60] sm:$0xff]  ;;  %v1847_v5 = vld [vmem:[%s1839_s7 + $0x10] sm:$0xff]  ;;  %v1863_v7 = vld [vmem:[%s1839_s7 + $0x68] sm:$0xff]  ;;  %s1312_s29 = sshll.u32 %s1309_s28, 4  ;;  %s1313_s29 = int_to_ptr.hbm [resolvable:$true] %s1312_s29 }
  0x1c   : > { %v229_v3 = vld.sshfl [vmem:[#allocation1] sm:$0xff pattern:$0x75316420]  ;;  %v230_v4 = vld.sshfl [vmem:[#allocation1 + $0x8] sm:$0xff pattern:$0x75316420] }
  0x1d   : > { %1529 = vmatpush.msk.msra.mxu2 %vm292_vm0, %v229_v3  ;;  %1530 = vmatpush.msk.msra.mxu3 %vm292_vm0, %v230_v4  ;;  %452 = vst [vmem:[#allocation1] ss:$2 sm:$0xff] %v224_v1  ;;  %v1867_v10 = vld [vmem:[%s1839_s7 + $0x18] sm:$0xff]  ;;  %v1879_v11 = vld [vmem:[%s1839_s7 + $0x70] sm:$0xff]  ;;  %v1883_v14 = vld [vmem:[%s1839_s7 + $0x20] sm:$0xff]  ;;  %s1685_s4 = sshra.s32 %s1313_s29, 4  ;;  %s1686_s4 = int_to_ptr.hbm [resolvable:$true] %s1685_s4 }
  0x1e   : > { %1410 = vmatmul.msk.f32.vlgmr.msra.gmra.mxu2 %vm231_vm1, %v1842_v2  ;;  %1431 = vmatmul.msk.f32.vlgmr.msra.gmra.mxu3 %vm231_vm1, %v1842_v2  ;;  %v1895_v15 = vld [vmem:[%s1839_s7 + $0x78] sm:$0xff]  ;;  %v1898_v16 = vld [vmem:[%s1839_s7 + $0x28] sm:$0xff]  ;;  %v1909_v17 = vld [vmem:[%s1839_s7 + $0x80] sm:$0xff]  ;;  %s1687_s5 = scalar_lea.hbm %s1686_s4, 160  ;;  %p1692_p1 = scmp.lt.s32.totalorder %s1686_s4, %s2549_s3 }
  0x1f   : > { %1399 = vmatpush.msk.msra.mxu0 %vm292_vm0, %v229_v3  ;;  %1420 = vmatpush.msk.msra.mxu1 %vm292_vm0, %v230_v4  ;;  %v1912_v18 = vld [vmem:[%s1839_s7 + $0x30] sm:$0xff]  ;;  %v1923_v19 = vld [vmem:[%s1839_s7 + $0x88] sm:$0xff]  ;;  %v1926_v20 = vld [vmem:[%s1839_s7 + $0x38] sm:$0xff]  ;;  %p1688_p12 = scmp.ne.s32.totalorder %s1686_s4, %s1687_s5  ;;  %p1693_p2 = scmp.lt.s32.totalorder %s1691_s8, %s1687_s5 }
  0x20   : > { %1400 = vmatmul.msk.f32.vlgmr.msra.gmra.mxu0 %vm231_vm1, %v1847_v5  ;;  %1421 = vmatmul.msk.f32.vlgmr.msra.gmra.mxu1 %vm231_vm1, %v1847_v5  ;;  %v1937_v21 = vld [vmem:[%s1839_s7 + $0x90] sm:$0xff]  ;;  %v1940_v22 = vld [vmem:[%s1839_s7 + $0x40] sm:$0xff]  ;;  %v1951_v23 = vld [vmem:[%s1839_s7 + $0x98] sm:$0xff] }
  0x21   : > { %v1954_v24 = vld [vmem:[%s1839_s7 + $0x48] sm:$0xff]  ;;  %v1965_v25 = vld [vmem:[%s1839_s7 + $0xa0] sm:$0xff]  ;;  %v1968_v26 = vld [vmem:[%s1839_s7 + $0x50] sm:$0xff]  ;;  %p1689_p13 = pnand %p1688_p12, %p1813_p4  ;;  %p1694_p3 = por %p1693_p2, %p1692_p1 }
  0x22   : > { %v1979_v27 = vld [vmem:[%s1839_s7 + $0xa8] sm:$0xff]  ;;  %v1982_v28 = vld [vmem:[%s1839_s7 + $0x58] sm:$0xff]  ;;  %v200_v29 = vld [vmem:[%s1839_s7] sm:$0xff] }
  0x23   : > { %v201_v30 = vld [vmem:[%s1839_s7 + $0x8] sm:$0xff]  ;;  %p1690_p0 = pneg %p1689_p13 }
  0x24   : > { %v453_v8 = vld.sshfl [vmem:[#allocation1] sm:$0xff pattern:$0x75316420]  ;;  %v454_v9 = vld.sshfl [vmem:[#allocation1 + $0x8] sm:$0xff pattern:$0x75316420] }
  0x25   : > { %1462 = vmatpush.msk.msrb.mxu3 %vm292_vm0, %v454_v9  ;;  %622 = vst [vmem:[#allocation1] ss:$2 sm:$0xff] %v1483_v6  ;;  %1441 = vmatpush.msk.msrb.mxu2 %vm292_vm0, %v453_v8  ;;  %v829_v9 = vld [vmem:[%s2548_s2] sm:$0x3]  ;;  %p1695_p5 = pnand %p1694_p3, %p1690_p0 }
  0x26   : > { %1411 = vmatmul.msk.f32.gmra.mxu2 %vm231_vm1, %v1863_v7  ;;  %1432 = vmatmul.msk.f32.gmra.mxu3 %vm231_vm1, %v1863_v7 }
  0x28   : > { %1401 = vmatmul.msk.f32.gmra.mxu0 %vm231_vm1, %v1867_v10  ;;  %1422 = vmatmul.msk.f32.gmra.mxu1 %vm231_vm1, %v1867_v10 }
  0x2c   : > { %v624_v12 = vld.sshfl [vmem:[#allocation1 + $0x8] sm:$0xff pattern:$0x75316420]  ;;  %v623_v13 = vld.sshfl [vmem:[#allocation1] sm:$0xff pattern:$0x75316420] }
  0x2d   : > { %1505 = vmatpush.msk.msrb.mxu1 %vm292_vm0, %v624_v12  ;;  %1484 = vmatpush.msk.msrb.mxu0 %vm292_vm0, %v623_v13  ;;  %v2212_v13 = vperm.slane %v829_v9, 1 }
  0x2e   : > { %1412 = vmatmul.msk.f32.gmra.mxu2 %vm231_vm1, %v1879_v11  ;;  %1433 = vmatmul.msk.f32.gmra.mxu3 %vm231_vm1, %v1879_v11 }
  0x30   : > { %1402 = vmatmul.msk.f32.gmra.mxu0 %vm231_vm1, %v1883_v14  ;;  %1423 = vmatmul.msk.f32.gmra.mxu1 %vm231_vm1, %v1883_v14 }
  0x36   : > { %1413 = vmatmul.msk.f32.gmra.mxu2 %vm231_vm1, %v1895_v15  ;;  %1434 = vmatmul.msk.f32.gmra.mxu3 %vm231_vm1, %v1895_v15 }
  0x38   : > { %1403 = vmatmul.msk.f32.gmra.mxu0 %vm231_vm1, %v1898_v16  ;;  %1424 = vmatmul.msk.f32.gmra.mxu1 %vm231_vm1, %v1898_v16 }
  0x3e   : > { %1414 = vmatmul.msk.f32.gmra.mxu2 %vm231_vm1, %v1909_v17  ;;  %1435 = vmatmul.msk.f32.gmra.mxu3 %vm231_vm1, %v1909_v17 }
  0x40   : > { %1404 = vmatmul.msk.f32.gmra.mxu0 %vm231_vm1, %v1912_v18  ;;  %1425 = vmatmul.msk.f32.gmra.mxu1 %vm231_vm1, %v1912_v18 }
  0x46   : > { %1415 = vmatmul.msk.f32.gmra.mxu2 %vm231_vm1, %v1923_v19  ;;  %1436 = vmatmul.msk.f32.gmra.mxu3 %vm231_vm1, %v1923_v19 }
  0x48   : > { %1405 = vmatmul.msk.f32.gmra.mxu0 %vm231_vm1, %v1926_v20  ;;  %1426 = vmatmul.msk.f32.gmra.mxu1 %vm231_vm1, %v1926_v20 }
  0x4e   : > { %1416 = vmatmul.msk.f32.gmra.mxu2 %vm231_vm1, %v1937_v21  ;;  %1437 = vmatmul.msk.f32.gmra.mxu3 %vm231_vm1, %v1937_v21 }
  0x50   : > { %1406 = vmatmul.msk.f32.gmra.mxu0 %vm231_vm1, %v1940_v22  ;;  %1427 = vmatmul.msk.f32.gmra.mxu1 %vm231_vm1, %v1940_v22 }
  0x56   : > { %1417 = vmatmul.msk.f32.gmra.mxu2 %vm231_vm1, %v1951_v23  ;;  %1438 = vmatmul.msk.f32.gmra.mxu3 %vm231_vm1, %v1951_v23 }
  0x58   : > { %1407 = vmatmul.msk.f32.gmra.mxu0 %vm231_vm1, %v1954_v24  ;;  %1428 = vmatmul.msk.f32.gmra.mxu1 %vm231_vm1, %v1954_v24 }
  0x5e   : > { %1418 = vmatmul.msk.f32.gmra.mxu2 %vm231_vm1, %v1965_v25  ;;  %1439 = vmatmul.msk.f32.gmra.mxu3 %vm231_vm1, %v1965_v25 }
  0x60   : > { %1408 = vmatmul.msk.f32.gmra.mxu0 %vm231_vm1, %v1968_v26  ;;  %1429 = vmatmul.msk.f32.gmra.mxu1 %vm231_vm1, %v1968_v26 }
  0x66   : > { %1419 = vmatmul.msk.f32.gmra.mxu2 %vm231_vm1, %v1979_v27  ;;  %1440 = vmatmul.msk.f32.gmra.mxu3 %vm231_vm1, %v1979_v27 }
  0x68   : > { %1409 = vmatmul.msk.f32.gmra.mxu0 %vm231_vm1, %v1982_v28  ;;  %1430 = vmatmul.msk.f32.gmra.mxu1 %vm231_vm1, %v1982_v28 }
  0x6e   : > { %1442 = vmatmul.msk.f32.vlgmr.msrb.gmra.mxu2 %vm231_vm1, %v200_v29  ;;  %1463 = vmatmul.msk.f32.vlgmr.msrb.gmra.mxu3 %vm231_vm1, %v200_v29 }
  0x70   : > { %1485 = vmatmul.msk.f32.vlgmr.msrb.gmra.mxu0 %vm231_vm1, %v1883_v14  ;;  %1506 = vmatmul.msk.f32.vlgmr.msrb.gmra.mxu1 %vm231_vm1, %v1883_v14 }
  0x76   : > { %1443 = vmatmul.msk.f32.gmra.mxu2 %vm231_vm1, %v201_v30  ;;  %1464 = vmatmul.msk.f32.gmra.mxu3 %vm231_vm1, %v201_v30  ;;  %v222_v30 = vld [vmem:[%s1839_s7 + $0xb0] sm:$0xff] }
  0x78   : > { %1486 = vmatmul.msk.f32.gmra.mxu0 %vm231_vm1, %v1898_v16  ;;  %1507 = vmatmul.msk.f32.gmra.mxu1 %vm231_vm1, %v1898_v16 }
  0x7e   : > { %1444 = vmatmul.msk.f32.gmra.mxu2 %vm231_vm1, %v1847_v5  ;;  %1465 = vmatmul.msk.f32.gmra.mxu3 %vm231_vm1, %v1847_v5 }
  0x80   : > { %1487 = vmatmul.msk.f32.gmra.mxu0 %vm231_vm1, %v1912_v18  ;;  %1508 = vmatmul.msk.f32.gmra.mxu1 %vm231_vm1, %v1912_v18 }
  0x86   : > { %1445 = vmatmul.msk.f32.gmra.mxu2 %vm231_vm1, %v1867_v10  ;;  %1466 = vmatmul.msk.f32.gmra.mxu3 %vm231_vm1, %v1867_v10 }
  0x88   : > { %1488 = vmatmul.msk.f32.gmra.mxu0 %vm231_vm1, %v1926_v20  ;;  %1509 = vmatmul.msk.f32.gmra.mxu1 %vm231_vm1, %v1926_v20 }
  0x8e   : > { %1446 = vmatmul.msk.f32.gmra.mxu2 %vm231_vm1, %v1883_v14  ;;  %1467 = vmatmul.msk.f32.gmra.mxu3 %vm231_vm1, %v1883_v14 }
  0x90   : > { %1489 = vmatmul.msk.f32.gmra.mxu0 %vm231_vm1, %v1940_v22  ;;  %1510 = vmatmul.msk.f32.gmra.mxu1 %vm231_vm1, %v1940_v22 }
  0x96   : > { %1447 = vmatmul.msk.f32.gmra.mxu2 %vm231_vm1, %v1898_v16  ;;  %1468 = vmatmul.msk.f32.gmra.mxu3 %vm231_vm1, %v1898_v16 }
  0x98   : > { %1490 = vmatmul.msk.f32.gmra.mxu0 %vm231_vm1, %v1954_v24  ;;  %1511 = vmatmul.msk.f32.gmra.mxu1 %vm231_vm1, %v1954_v24 }
  0x9d   : > { %v2038_v31 = vpop.f32.mrf.mxu0  ;;  %v2040_v32 = vpop.f32.mrf.mxu1 }
  0x9e   : > { %1448 = vmatmul.msk.f32.gmra.mxu2 %vm231_vm1, %v1912_v18  ;;  %1469 = vmatmul.msk.f32.gmra.mxu3 %vm231_vm1, %v1912_v18 }
  0xa0   : > { %1491 = vmatmul.msk.f32.gmra.mxu0 %vm231_vm1, %v1968_v26  ;;  %1512 = vmatmul.msk.f32.gmra.mxu1 %vm231_vm1, %v1968_v26 }
  0xa1   : > { %v2050_v33 = vpop.f32.mrf.mxu2  ;;  %v2052_v34 = vpop.f32.mrf.mxu3 }
  0xa5   : > { %v2054_v35 = vpop.f32.mrf.mxu0  ;;  %v2056_v36 = vpop.f32.mrf.mxu1 }
  0xa6   : > { %1449 = vmatmul.msk.f32.gmra.mxu2 %vm231_vm1, %v1926_v20  ;;  %1470 = vmatmul.msk.f32.gmra.mxu3 %vm231_vm1, %v1926_v20 }
  0xa8   : > { %1492 = vmatmul.msk.f32.gmra.mxu0 %vm231_vm1, %v1982_v28  ;;  %1513 = vmatmul.msk.f32.gmra.mxu1 %vm231_vm1, %v1982_v28 }
  0xa9   : > { %v2066_v37 = vpop.f32.mrf.mxu2  ;;  %v2068_v38 = vpop.f32.mrf.mxu3 }
  0xad   : > { %v2070_v39 = vpop.f32.mrf.mxu0  ;;  %v2072_v40 = vpop.f32.mrf.mxu1 }
  0xae   : > { %1450 = vmatmul.msk.f32.gmra.mxu2 %vm231_vm1, %v1940_v22  ;;  %1471 = vmatmul.msk.f32.gmra.mxu3 %vm231_vm1, %v1940_v22 }
  0xb0   : > { %1493 = vmatmul.msk.f32.gmra.mxu0 %vm231_vm1, %v1842_v2  ;;  %1514 = vmatmul.msk.f32.gmra.mxu1 %vm231_vm1, %v1842_v2 }
  0xb1   : > { %v2082_v41 = vpop.f32.mrf.mxu2  ;;  %v2084_v42 = vpop.f32.mrf.mxu3 }
  0xb5   : > { %v2086_v43 = vpop.f32.mrf.mxu0  ;;  %v2088_v44 = vpop.f32.mrf.mxu1 }
  0xb6   : > { %1451 = vmatmul.msk.f32.gmra.mxu2 %vm231_vm1, %v1954_v24  ;;  %1472 = vmatmul.msk.f32.gmra.mxu3 %vm231_vm1, %v1954_v24 }
  0xb8   : > { %1494 = vmatmul.msk.f32.gmra.mxu0 %vm231_vm1, %v1863_v7  ;;  %1515 = vmatmul.msk.f32.gmra.mxu1 %vm231_vm1, %v1863_v7 }
  0xb9   : > { %v2098_v45 = vpop.f32.mrf.mxu2  ;;  %v2100_v46 = vpop.f32.mrf.mxu3 }
  0xbd   : > { %v2102_v47 = vpop.f32.mrf.mxu0  ;;  %v2104_v48 = vpop.f32.mrf.mxu1 }
  0xbe   : > { %1452 = vmatmul.msk.f32.gmra.mxu2 %vm231_vm1, %v1968_v26  ;;  %1473 = vmatmul.msk.f32.gmra.mxu3 %vm231_vm1, %v1968_v26 }
  0xc0   : > { %1495 = vmatmul.msk.f32.gmra.mxu0 %vm231_vm1, %v1879_v11  ;;  %1516 = vmatmul.msk.f32.gmra.mxu1 %vm231_vm1, %v1879_v11 }
  0xc1   : > { %v2114_v49 = vpop.f32.mrf.mxu2  ;;  %v2116_v50 = vpop.f32.mrf.mxu3 }
  0xc5   : > { %v2118_v51 = vpop.f32.mrf.mxu0  ;;  %v2120_v52 = vpop.f32.mrf.mxu1 }
  0xc6   : > { %1453 = vmatmul.msk.f32.gmra.mxu2 %vm231_vm1, %v1982_v28  ;;  %1474 = vmatmul.msk.f32.gmra.mxu3 %vm231_vm1, %v1982_v28 }
  0xc8   : > { %1496 = vmatmul.msk.f32.gmra.mxu0 %vm231_vm1, %v1895_v15  ;;  %1517 = vmatmul.msk.f32.gmra.mxu1 %vm231_vm1, %v1895_v15 }
  0xc9   : > { %v2130_v53 = vpop.f32.mrf.mxu2  ;;  %v2132_v54 = vpop.f32.mrf.mxu3 }
  0xcd   : > { %v2134_v55 = vpop.f32.mrf.mxu0  ;;  %v2136_v56 = vpop.f32.mrf.mxu1 }
  0xce   : > { %1454 = vmatmul.msk.f32.gmra.mxu2 %vm231_vm1, %v1842_v2  ;;  %1475 = vmatmul.msk.f32.gmra.mxu3 %vm231_vm1, %v1842_v2 }
  0xd0   : > { %1497 = vmatmul.msk.f32.gmra.mxu0 %vm231_vm1, %v1909_v17  ;;  %1518 = vmatmul.msk.f32.gmra.mxu1 %vm231_vm1, %v1909_v17 }
  0xd1   : > { %v2146_v57 = vpop.f32.mrf.mxu2  ;;  %v2148_v58 = vpop.f32.mrf.mxu3 }
  0xd2   : > { %2552 = vst [vmem:[#allocation5_spill] sm:$0xff] %v2146_v57 }
  0xd5   : > { %v2150_v59 = vpop.f32.mrf.mxu0  ;;  %v2152_v60 = vpop.f32.mrf.mxu1 }
  0xd6   : > { %1455 = vmatmul.msk.f32.gmra.mxu2 %vm231_vm1, %v1863_v7  ;;  %1476 = vmatmul.msk.f32.gmra.mxu3 %vm231_vm1, %v1863_v7 }
  0xd8   : > { %1498 = vmatmul.msk.f32.gmra.mxu0 %vm231_vm1, %v1923_v19  ;;  %1519 = vmatmul.msk.f32.gmra.mxu1 %vm231_vm1, %v1923_v19 }
  0xd9   : > { %v2162_v61 = vpop.f32.mrf.mxu2  ;;  %v2164_v62 = vpop.f32.mrf.mxu3 }
  0xda   : > { %2553 = vst [vmem:[#allocation6_spill] sm:$0xff] %v2162_v61 }
  0xdd   : > { %v2166_v63 = vpop.f32.mrf.mxu0  ;;  %v2168_v0 = vpop.f32.mrf.mxu1 }
  0xde   : > { %1456 = vmatmul.msk.f32.gmra.mxu2 %vm231_vm1, %v1879_v11  ;;  %1477 = vmatmul.msk.f32.gmra.mxu3 %vm231_vm1, %v1879_v11 }
  0xe0   : > { %1499 = vmatmul.msk.f32.gmra.mxu0 %vm231_vm1, %v1937_v21  ;;  %1520 = vmatmul.msk.f32.gmra.mxu1 %vm231_vm1, %v1937_v21 }
  0xe1   : > { %v2178_v1 = vpop.f32.mrf.mxu2  ;;  %v2180_v2 = vpop.f32.mrf.mxu3 }
  0xe2   : > { %2554 = vst [vmem:[#allocation7_spill] sm:$0xff] %v2178_v1 }
  0xe5   : > { %v2182_v3 = vpop.f32.mrf.mxu0  ;;  %v2184_v4 = vpop.f32.mrf.mxu1 }
  0xe6   : > { %1457 = vmatmul.msk.f32.gmra.mxu2 %vm231_vm1, %v1895_v15  ;;  %1478 = vmatmul.msk.f32.gmra.mxu3 %vm231_vm1, %v1895_v15 }
  0xe8   : > { %1500 = vmatmul.msk.f32.gmra.mxu0 %vm231_vm1, %v1951_v23  ;;  %1521 = vmatmul.msk.f32.gmra.mxu1 %vm231_vm1, %v1951_v23 }
  0xe9   : > { %v2194_v5 = vpop.f32.mrf.mxu2  ;;  %v2196_v6 = vpop.f32.mrf.mxu3 }
  0xea   : > { %2555 = vst [vmem:[#allocation8_spill] sm:$0xff] %v2194_v5 }
  0xed   : > { %v2198_v7 = vpop.f32.mrf.mxu0  ;;  %v729_v8 = vpop.f32.mrf.mxu1 }
  0xee   : > { %1458 = vmatmul.msk.f32.gmra.mxu2 %vm231_vm1, %v1909_v17  ;;  %1479 = vmatmul.msk.f32.gmra.mxu3 %vm231_vm1, %v1909_v17 }
  0xf0   : > { %1501 = vmatmul.msk.f32.gmra.mxu0 %vm231_vm1, %v1965_v25  ;;  %1522 = vmatmul.msk.f32.gmra.mxu1 %vm231_vm1, %v1965_v25 }
  0xf1   : > { %v482_v10 = vpop.f32.mrf.mxu2  ;;  %v559_v11 = vpop.f32.mrf.mxu3 }
  0xf2   : > { %v560_v12 = vadd.f32 %v559_v11, %v2040_v32 }
  0xf4   : > { %v790_v14 = vadd.f32 %v729_v8, %v560_v12 }
  0xf5   : > { %v2214_v15 = vpop.f32.mrf.mxu0  ;;  %v732_v16 = vpop.f32.mrf.mxu1 }
  0xf6   : > { %v836_v17 = vadd.f32 %v2212_v13, %v790_v14  ;;  %1459 = vmatmul.msk.f32.gmra.mxu2 %vm231_vm1, %v1923_v19  ;;  %1480 = vmatmul.msk.f32.gmra.mxu3 %vm231_vm1, %v1923_v19 }
  0xf8   : > { %v875_v18 = vsub.f32 0.0, %v836_v17  ;;  %1502 = vmatmul.msk.f32.gmra.mxu0 %vm231_vm1, %v1979_v27  ;;  %1523 = vmatmul.msk.f32.gmra.mxu1 %vm231_vm1, %v1979_v27 }
  0xf9   : > { %v2225_v20 = vpop.f32.mrf.mxu2  ;;  %v562_v22 = vpop.f32.mrf.mxu3 }
  0xfa   : > { %v895_v24 = vmul.f32 1.442695, %v875_v18  ;;  %v563_v25 = vadd.f32 %v562_v22, %v2056_v36  ;;  %v223_v18 = vld [vmem:[%s1839_s7 + $0xb8] sm:$0xff] }
  0xfc   : > { %1591 = vpow2.f32 %v895_v24  ;;  %v792_v26 = vadd.f32 %v732_v16, %v563_v25 }
  0xfd   : > { %v2228_v28 = vpop.f32.mrf.mxu0  ;;  %v735_v29 = vpop.f32.mrf.mxu1 }
  0xfe   : > { %v838_v19 = vadd.f32 %v2212_v13, %v792_v26  ;;  %1460 = vmatmul.msk.f32.gmra.mxu2 %vm231_vm1, %v1937_v21  ;;  %1481 = vmatmul.msk.f32.gmra.mxu3 %vm231_vm1, %v1937_v21 }
 0x100   : > { %v876_v27 = vsub.f32 0.0, %v838_v19  ;;  %1503 = vmatmul.msk.f32.gmra.mxu0 %vm231_vm1, %v222_v30  ;;  %1524 = vmatmul.msk.f32.gmra.mxu1 %vm231_vm1, %v222_v30 }
 0x101   : > { %v2238_v32 = vpop.f32.mrf.mxu2  ;;  %v565_v36 = vpop.f32.mrf.mxu3 }
 0x102   : > { %v1592_v8 = vpop.eup %1591  ;;  %v897_v11 = vmul.f32 1.442695, %v876_v27  ;;  %v566_v12 = vadd.f32 %v565_v36, %v2072_v40 }
 0x103   : > { %v935_v14 = vadd.f32 1.0, %v1592_v8 }
 0x104   : > { %1593 = vpow2.f32 %v897_v11  ;;  %v794_v16 = vadd.f32 %v735_v29, %v566_v12  ;;  %v483_v29 = vadd.f32 %v482_v10, %v2038_v31  ;;  %v2259_v12 = vperm.slane %v829_v9, 0 }
 0x105   : > { %1595 = vrcp.f32 %v935_v14  ;;  %v738_v17 = vpop.f32.mrf.mxu1  ;;  %v2247_v22 = vpop.f32.mrf.mxu0  ;;  %v966_v31 = vand.u32 2147483648, %v935_v14  ;;  %vm960_vm3 = vweird.f32 %v935_v14 }
 0x106   : > { %v840_v21 = vadd.f32 %v2212_v13, %v794_v16  ;;  %1461 = vmatmul.msk.f32.gmra.mxu2 %vm231_vm1, %v1951_v23  ;;  %1482 = vmatmul.msk.f32.gmra.mxu3 %vm231_vm1, %v1951_v23  ;;  %v789_v11 = vadd.f32 %v2198_v7, %v483_v29 }
 0x108   : > { %v877_v24 = vsub.f32 0.0, %v840_v21  ;;  %1504 = vmatmul.msk.f32.gmra.mxu0 %vm231_vm1, %v223_v18  ;;  %1525 = vmatmul.msk.f32.gmra.mxu1 %vm231_vm1, %v223_v18  ;;  %v835_v7 = vadd.f32 %v2259_v12, %v789_v11 }
 0x109   : > { %v2251_v40 = vpop.f32.mrf.mxu2  ;;  %v568_v25 = vpop.f32.mrf.mxu3 }
 0x10a   : > { %v1594_v26 = vpop.eup %1593  ;;  %v899_v30 = vmul.f32 1.442695, %v877_v24  ;;  %v569_v19 = vadd.f32 %v568_v25, %v2088_v44  ;;  %v964_v44 = vand.u32 2147483647, %v935_v14 }
 0x10b   : > { %v1596_v27 = vpop.eup %1595  ;;  %v2255_v36 = vadd.f32 1.0, %v1594_v26 }
 0x10c   : > { %v956_v23 = vmul.f32 %v1596_v27, %v935_v14  ;;  %1597 = vpow2.f32 %v899_v30  ;;  %v796_v18 = vadd.f32 %v738_v17, %v569_v19  ;;  %vm961_vm2 = vweird.f32 %v1596_v27 }
 0x10d   : > { %1599 = vrcp.f32 %v2255_v36  ;;  %v741_v8 = vpop.f32.mrf.mxu1  ;;  %v2263_v24 = vpop.f32.mrf.mxu0  ;;  %vm962_vm4 = vmor %vm960_vm3, %vm961_vm2  ;;  %v967_v19 = vor.u32 1.1754944e-38, %v966_v31  ;;  %vm965_vm5 = vcmp.eq.f32.partialorder %v964_v44, 8.507059e+37  ;;  %v981_v31 = vand.u32 2147483648, %v2255_v36 }
 0x10e   : > { %v957_v16 = vsub.f32 1.0, %v956_v23  ;;  %v842_v21 = vadd.f32 %v2212_v13, %v796_v18  ;;  %v486_v23 = vadd.f32 %v2225_v20, %v2054_v35  ;;  %v979_v20 = vand.u32 2147483647, %v2255_v36 }
 0x10f   : > { %vm975_vm7 = vweird.f32 %v2255_v36 }
 0x110   : > { %v958_v10 = vmul.f32 %v1596_v27, %v957_v16  ;;  %v878_v29 = vsub.f32 0.0, %v842_v21  ;;  %v791_v35 = vadd.f32 %v2214_v15, %v486_v23  ;;  %v489_v15 = vadd.f32 %v2238_v32, %v2070_v39 }
 0x111   : > { %v2267_v25 = vpop.f32.mrf.mxu2  ;;  %v571_v26 = vpop.f32.mrf.mxu3  ;;  %vm980_vm9 = vcmp.eq.f32.partialorder %v979_v20, 8.507059e+37 }
 0x112   : > { %v1598_v30 = vpop.eup %1597  ;;  %v959_v9 = vadd.f32 %v1596_v27, %v958_v10  ;;  %v572_v18 = vadd.f32 %v571_v26, %v2104_v48  ;;  %v901_v61 = vmul.f32 1.442695, %v878_v29  ;;  %v982_v26 = vor.u32 1.1754944e-38, %v981_v31 }
 0x113   : > { %v1600_v17 = vpop.eup %1599  ;;  %v2272_v16 = vadd.f32 1.0, %v1598_v30 }
 0x114   : > { %v963_v5 = vsel %vm962_vm4, %v1596_v27, %v959_v9  ;;  %v971_v1 = vmul.f32 %v1600_v17, %v2255_v36  ;;  %v798_v21 = vadd.f32 %v741_v8, %v572_v18  ;;  %vm976_vm6 = vweird.f32 %v1600_v17 }
 0x115   : > { %v968_v57 = vsel %vm965_vm5, %v967_v19, %v963_v5  ;;  %1601 = vrcp.f32 %v2272_v16  ;;  %v744_v14 = vpop.f32.mrf.mxu1  ;;  %v2288_v8 = vpop.f32.mrf.mxu0  ;;  %vm977_vm8 = vmor %vm975_vm7, %vm976_vm6  ;;  %v837_v9 = vadd.f32 %v2259_v12, %v791_v35  ;;  %v994_v39 = vand.u32 2147483647, %v2272_v16 }
 0x116   : > { %v1255_v11 = vmul.f32 %v968_v57, %v835_v7  ;;  %v972_v10 = vsub.f32 1.0, %v971_v1  ;;  %1603 = vpow2.f32 %v901_v61  ;;  %v844_v5 = vadd.f32 %v2212_v13, %v798_v21 }
 0x117   : > { %v793_v21 = vadd.f32 %v2228_v28, %v489_v15  ;;  %v996_v32 = vand.u32 2147483648, %v2272_v16  ;;  %vm990_vm11 = vweird.f32 %v2272_v16  ;;  %vm995_vm13 = vcmp.eq.f32.partialorder %v994_v39, 8.507059e+37 }
 0x118   : > { %1275 = vst [vmem:[%s2278_s21] sm:$0xff] %v1255_v11  ;;  %v973_v48 = vmul.f32 %v1600_v17, %v972_v10  ;;  %v879_v30 = vsub.f32 0.0, %v844_v5 }
 0x119   : > { %v2284_v27 = vpop.f32.mrf.mxu2  ;;  %v574_v57 = vpop.f32.mrf.mxu3 }
 0x11a   : > { %v974_v1 = vadd.f32 %v1600_v17, %v973_v48  ;;  %v575_v61 = vadd.f32 %v574_v57, %v2120_v52  ;;  %v903_v52 = vmul.f32 1.442695, %v879_v30  ;;  %v839_v57 = vadd.f32 %v2259_v12, %v793_v21 }
 0x11b   : > { %v1602_v44 = vpop.eup %1601 }
 0x11c   : > { %v1604_v7 = vpop.eup %1603  ;;  %v978_v29 = vsel %vm977_vm8, %v1600_v17, %v974_v1  ;;  %v986_v19 = vmul.f32 %v1602_v44, %v2272_v16  ;;  %v800_v18 = vadd.f32 %v744_v14, %v575_v61  ;;  %vm991_vm10 = vweird.f32 %v1602_v44 }
 0x11d   : > { %v983_v36 = vsel %vm980_vm9, %v982_v26, %v978_v29  ;;  %v2294_v23 = vadd.f32 1.0, %v1604_v7  ;;  %v747_v11 = vpop.f32.mrf.mxu1  ;;  %vm992_vm12 = vmor %vm990_vm11, %vm991_vm10  ;;  %v997_v1 = vor.u32 1.1754944e-38, %v996_v32  ;;  %v2307_v15 = vpop.f32.mrf.mxu0  ;;  %v492_v29 = vadd.f32 %v2251_v40, %v2086_v43 }
 0x11e   : > { %v1256_v10 = vmul.f32 %v983_v36, %v837_v9  ;;  %v987_v31 = vsub.f32 1.0, %v986_v19  ;;  %v846_v35 = vadd.f32 %v2212_v13, %v800_v18 }
 0x11f   : > { %1605 = vrcp.f32 %v2294_v23  ;;  %vm1005_vm15 = vweird.f32 %v2294_v23 }
 0x120   : > { %1276 = vst [vmem:[%s2278_s21 + $0x8] sm:$0xff] %v1256_v10  ;;  %v988_v17 = vmul.f32 %v1602_v44, %v987_v31  ;;  %1607 = vpow2.f32 %v903_v52  ;;  %v880_v5 = vsub.f32 0.0, %v846_v35  ;;  %v795_v10 = vadd.f32 %v2247_v22, %v492_v29 }
 0x121   : > { %v2302_v48 = vpop.f32.mrf.mxu2  ;;  %v577_v14 = vpop.f32.mrf.mxu3  ;;  %v1011_v31 = vand.u32 2147483648, %v2294_v23 }
 0x122   : > { %v989_v20 = vadd.f32 %v1602_v44, %v988_v17  ;;  %v578_v28 = vadd.f32 %v577_v14, %v2136_v56  ;;  %v905_v26 = vmul.f32 1.442695, %v880_v5 }
 0x123   : > { %v1012_v5 = vor.u32 1.1754944e-38, %v1011_v31 }
 0x124   : > { %v993_v61 = vsel %vm992_vm12, %v1602_v44, %v989_v20  ;;  %v802_v30 = vadd.f32 %v747_v11, %v578_v28  ;;  %1609 = vpow2.f32 %v905_v26  ;;  %v1009_v11 = vand.u32 2147483647, %v2294_v23 }
 0x125   : > { %v1606_v7 = vpop.eup %1605  ;;  %v998_v9 = vsel %vm995_vm13, %v997_v1, %v993_v61  ;;  %v750_v16 = vpop.f32.mrf.mxu1  ;;  %v841_v20 = vadd.f32 %v2259_v12, %v795_v10 }
 0x126   : > { %v1608_v19 = vpop.eup %1607  ;;  %v1257_v36 = vmul.f32 %v998_v9, %v839_v57  ;;  %v1001_v56 = vmul.f32 %v1606_v7, %v2294_v23  ;;  %v848_v44 = vadd.f32 %v2212_v13, %v802_v30  ;;  %vm1006_vm14 = vweird.f32 %v1606_v7  ;;  %v2327_v61 = vpop.f32.mrf.mxu0 }
 0x127   : > { %v2312_v52 = vadd.f32 1.0, %v1608_v19  ;;  %vm1007_vm0 = vmor %vm1005_vm15, %vm1006_vm14  ;;  %vm1010_vm1 = vcmp.eq.f32.partialorder %v1009_v11, 8.507059e+37  ;;  %v495_v23 = vadd.f32 %v2267_v25, %v2102_v47 }
 0x128   : > { %1277 = vst [vmem:[%s2278_s21 + $0x10] sm:$0xff] %v1257_v36  ;;  %v1002_v18 = vsub.f32 1.0, %v1001_v56  ;;  %v881_v21 = vsub.f32 0.0, %v848_v44 }
 0x129   : > { %1611 = vrcp.f32 %v2312_v52  ;;  %v580_v43 = vpop.f32.mrf.mxu3  ;;  %v2320_v39 = vpop.f32.mrf.mxu2  ;;  %v797_v56 = vadd.f32 %v2263_v24, %v495_v23  ;;  %v1026_v44 = vand.u32 2147483648, %v2312_v52  ;;  %v1024_v47 = vand.u32 2147483647, %v2312_v52 }
 0x12a   : > { %v1003_v40 = vmul.f32 %v1606_v7, %v1002_v18  ;;  %v581_v32 = vadd.f32 %v580_v43, %v2152_v60  ;;  %v1610_v17 = vpop.eup %1609  ;;  %v907_v14 = vmul.f32 1.442695, %v881_v21  ;;  %vm1020_vm3 = vweird.f32 %v2312_v52 }
 0x12b   : > { %v2325_v28 = vadd.f32 1.0, %v1610_v17  ;;  %v843_v17 = vadd.f32 %v2259_v12, %v797_v56  ;;  %vm1025_vm5 = vcmp.eq.f32.partialorder %v1024_v47, 8.507059e+37  ;;  %v501_v56 = vadd.f32 %v2302_v48, %v2134_v55 }
 0x12c   : > { %v1004_v35 = vadd.f32 %v1606_v7, %v1003_v40  ;;  %v804_v22 = vadd.f32 %v750_v16, %v581_v32  ;;  %1613 = vpow2.f32 %v907_v14  ;;  %v498_v40 = vadd.f32 %v2284_v27, %v2118_v51 }
 0x12d   : > { %v753_v57 = vpop.f32.mrf.mxu1  ;;  %1615 = vrcp.f32 %v2325_v28  ;;  %vm1035_vm7 = vweird.f32 %v2325_v28 }
 0x12e   : > { %v1008_v1 = vsel %vm1007_vm0, %v1606_v7, %v1004_v35  ;;  %v850_v60 = vadd.f32 %v2212_v13, %v804_v22  ;;  %v1027_v35 = vor.u32 1.1754944e-38, %v1026_v44  ;;  %v2349_v51 = vpop.f32.mrf.mxu0 }
 0x12f   : > { %v1612_v26 = vpop.eup %1611  ;;  %v1013_v30 = vsel %vm1010_vm1, %v1012_v5, %v1008_v1  ;;  %v799_v5 = vadd.f32 %v2288_v8, %v498_v40  ;;  %v801_v40 = vadd.f32 %v2307_v15, %v501_v56  ;;  %v504_v15 = vadd.f32 %v2320_v39, %v2150_v59 }
 0x130   : > { %v1258_v9 = vmul.f32 %v1013_v30, %v841_v20  ;;  %v1016_v29 = vmul.f32 %v1612_v26, %v2312_v52  ;;  %v882_v16 = vsub.f32 0.0, %v850_v60  ;;  %vm1021_vm2 = vweird.f32 %v1612_v26 }
 0x131   : > { %v583_v19 = vpop.f32.mrf.mxu3  ;;  %v2339_v25 = vpop.f32.mrf.mxu2  ;;  %vm1022_vm4 = vmor %vm1020_vm3, %vm1021_vm2  ;;  %v1039_v52 = vand.u32 2147483647, %v2325_v28  ;;  %v803_v39 = vadd.f32 %v2327_v61, %v504_v15 }
 0x132   : > { %1278 = vst [vmem:[%s2278_s21 + $0x18] sm:$0xff] %v1258_v9  ;;  %v1017_v7 = vsub.f32 1.0, %v1016_v29  ;;  %v584_v36 = vadd.f32 %v583_v19, %v2168_v0  ;;  %v909_v18 = vmul.f32 1.442695, %v882_v16  ;;  %v1614_v10 = vpop.eup %1613 }
 0x133   : > { %v1616_v43 = vpop.eup %1615  ;;  %v2343_v21 = vadd.f32 1.0, %v1614_v10  ;;  %vm1040_vm9 = vcmp.eq.f32.partialorder %v1039_v52, 8.507059e+37 }
 0x134   : > { %v1018_v11 = vmul.f32 %v1612_v26, %v1017_v7  ;;  %v806_v31 = vadd.f32 %v753_v57, %v584_v36  ;;  %1617 = vpow2.f32 %v909_v18  ;;  %v1031_v32 = vmul.f32 %v1616_v43, %v2325_v28 }
 0x135   : > { %v756_v0 = vpop.f32.mrf.mxu1  ;;  %1619 = vrcp.f32 %v2343_v21  ;;  %v1041_v57 = vand.u32 2147483648, %v2325_v28  ;;  %vm1036_vm6 = vweird.f32 %v1616_v43  ;;  %v845_v7 = vadd.f32 %v2259_v12, %v799_v5 }
 0x136   : > { %v1019_v24 = vadd.f32 %v1612_v26, %v1018_v11  ;;  %v1032_v22 = vsub.f32 1.0, %v1031_v32  ;;  %v852_v27 = vadd.f32 %v2212_v13, %v806_v31  ;;  %vm1037_vm8 = vmor %vm1035_vm7, %vm1036_vm6  ;;  %v2372_v32 = vpop.f32.mrf.mxu0  ;;  %vm1050_vm11 = vweird.f32 %v2343_v21 }
 0x137   : > { %v1042_v36 = vor.u32 1.1754944e-38, %v1041_v57 }
 0x138   : > { %v1023_v14 = vsel %vm1022_vm4, %v1612_v26, %v1019_v24  ;;  %v1033_v30 = vmul.f32 %v1616_v43, %v1032_v22  ;;  %v883_v23 = vsub.f32 0.0, %v852_v27  ;;  %v1056_v24 = vand.u32 2147483648, %v2343_v21 }
 0x139   : > { %v1028_v20 = vsel %vm1025_vm5, %v1027_v35, %v1023_v14  ;;  %v586_v1 = vpop.f32.mrf.mxu3  ;;  %v2365_v28 = vpop.f32.mrf.mxu2 }
 0x13a   : > { %v1259_v60 = vmul.f32 %v1028_v20, %v843_v17  ;;  %v1618_v26 = vpop.eup %1617  ;;  %v587_v9 = vadd.f32 %v586_v1, %v2184_v4  ;;  %v1034_v29 = vadd.f32 %v1616_v43, %v1033_v30  ;;  %v911_v19 = vmul.f32 1.442695, %v883_v23 }
 0x13b   : > { %v2358_v16 = vadd.f32 1.0, %v1618_v26  ;;  %v1620_v8 = vpop.eup %1619  ;;  %v1057_v20 = vor.u32 1.1754944e-38, %v1056_v24 }
 0x13c   : > { %1279 = vst [vmem:[%s2278_s21 + $0x20] sm:$0xff] %v1259_v60  ;;  %v808_v44 = vadd.f32 %v756_v0, %v587_v9  ;;  %v1038_v10 = vsel %vm1037_vm8, %v1616_v43, %v1034_v29  ;;  %v1046_v4 = vmul.f32 %v1620_v8, %v2343_v21  ;;  %vm1051_vm10 = vweird.f32 %v1620_v8 }
 0x13d   : > { %v759_v18 = vpop.f32.mrf.mxu1  ;;  %1621 = vrcp.f32 %v2358_v16  ;;  %v1043_v11 = vsel %vm1040_vm9, %v1042_v36, %v1038_v10  ;;  %v1054_v0 = vand.u32 2147483647, %v2343_v21  ;;  %vm1052_vm12 = vmor %vm1050_vm11, %vm1051_vm10  ;;  %v847_v60 = vadd.f32 %v2259_v12, %v801_v40 }
 0x13e   : > { %v1260_v47 = vmul.f32 %v1043_v11, %v845_v7  ;;  %v1047_v31 = vsub.f32 1.0, %v1046_v4  ;;  %1623 = vpow2.f32 %v911_v19  ;;  %v854_v55 = vadd.f32 %v2212_v13, %v808_v44  ;;  %v2392_v10 = vpop.f32.mrf.mxu0 }
 0x13f   : > { %vm1055_vm13 = vcmp.eq.f32.partialorder %v1054_v0, 8.507059e+37  ;;  %v1071_v9 = vand.u32 2147483648, %v2358_v16  ;;  %vm1065_vm15 = vweird.f32 %v2358_v16 }
 0x140   : > { %1280 = vst [vmem:[%s2278_s21 + $0x28] sm:$0xff] %v1260_v47  ;;  %v1048_v43 = vmul.f32 %v1620_v8, %v1047_v31  ;;  %v884_v35 = vsub.f32 0.0, %v854_v55  ;;  %v849_v47 = vadd.f32 %v2259_v12, %v803_v39 }
 0x141   : > { %v589_v48 = vpop.f32.mrf.mxu3  ;;  %v2385_v29 = vpop.f32.mrf.mxu2  ;;  %v1072_v61 = vor.u32 1.1754944e-38, %v1071_v9 }
 0x142   : > { %v590_v17 = vadd.f32 %v589_v48, %v2052_v34  ;;  %v1049_v22 = vadd.f32 %v1620_v8, %v1048_v43  ;;  %v913_v52 = vmul.f32 1.442695, %v884_v35 }
 0x143   : > { %v1622_v14 = vpop.eup %1621 }
 0x144   : > { %v810_v27 = vadd.f32 %v759_v18, %v590_v17  ;;  %v1061_v5 = vmul.f32 %v1622_v14, %v2358_v16  ;;  %v1624_v1 = vpop.eup %1623  ;;  %v1053_v30 = vsel %vm1052_vm12, %v1620_v8, %v1049_v22  ;;  %1625 = vpow2.f32 %v913_v52 }
 0x145   : > { %v762_v57 = vpop.f32.mrf.mxu1  ;;  %v1058_v23 = vsel %vm1055_vm13, %v1057_v20, %v1053_v30  ;;  %v2381_v26 = vadd.f32 1.0, %v1624_v1  ;;  %vm1066_vm14 = vweird.f32 %v1622_v14  ;;  %v1069_v8 = vand.u32 2147483647, %v2358_v16 }
 0x146   : > { %v856_v34 = vadd.f32 %v2212_v13, %v810_v27  ;;  %v1062_v21 = vsub.f32 1.0, %v1061_v5  ;;  %v1261_v59 = vmul.f32 %v1058_v23, %v847_v60  ;;  %vm1067_vm0 = vmor %vm1065_vm15, %vm1066_vm14  ;;  %v510_v20 = vadd.f32 %v2365_v28, %v2182_v3 }
 0x147   : > { %1627 = vrcp.f32 %v2381_v26  ;;  %vm1070_vm1 = vcmp.eq.f32.partialorder %v1069_v8, 8.507059e+37  ;;  %v1084_v1 = vand.u32 2147483647, %v2381_v26  ;;  %vm1080_vm3 = vweird.f32 %v2381_v26 }
 0x148   : > { %v885_v19 = vsub.f32 0.0, %v856_v34  ;;  %v1063_v7 = vmul.f32 %v1622_v14, %v1062_v21  ;;  %1281 = vst [vmem:[%s2278_s21 + $0x30] sm:$0xff] %v1261_v59  ;;  %v807_v39 = vadd.f32 %v2372_v32, %v510_v20  ;;  %v513_v8 = vadd.f32 %v2385_v29, %v2050_v33 }
 0x149   : > { %v592_v36 = vpop.f32.mrf.mxu3  ;;  %v2404_v27 = vpop.f32.mrf.mxu2  ;;  %vm1085_vm5 = vcmp.eq.f32.partialorder %v1084_v1, 8.507059e+37 }
 0x14a   : > { %v915_v56 = vmul.f32 1.442695, %v885_v19  ;;  %v593_v44 = vadd.f32 %v592_v36, %v2068_v38  ;;  %v1064_v18 = vadd.f32 %v1622_v14, %v1063_v7  ;;  %v1626_v11 = vpop.eup %1625  ;;  %v507_v38 = vadd.f32 %v2339_v25, %v2166_v63 }
 0x14b   : > { %v2397_v55 = vadd.f32 1.0, %v1626_v11  ;;  %v1086_v25 = vand.u32 2147483648, %v2381_v26  ;;  %v853_v32 = vadd.f32 %v2259_v12, %v807_v39 }
 0x14c   : > { %1629 = vpow2.f32 %v915_v56  ;;  %v812_v4 = vadd.f32 %v762_v57, %v593_v44  ;;  %v1068_v31 = vsel %vm1067_vm0, %v1622_v14, %v1064_v18  ;;  %v805_v22 = vadd.f32 %v2349_v51, %v507_v38 }
 0x14d   : > { %v765_v40 = vpop.f32.mrf.mxu1  ;;  %v1073_v24 = vsel %vm1070_vm1, %v1072_v61, %v1068_v31  ;;  %v1628_v48 = vpop.eup %1627  ;;  %1631 = vrcp.f32 %v2397_v55  ;;  %v1087_v23 = vor.u32 1.1754944e-38, %v1086_v25  ;;  %v1101_v44 = vand.u32 2147483648, %v2397_v55 }
 0x14e   : > { %v858_v16 = vadd.f32 %v2212_v13, %v812_v4  ;;  %v1262_v43 = vmul.f32 %v1073_v24, %v849_v47  ;;  %v1076_v0 = vmul.f32 %v1628_v48, %v2381_v26  ;;  %vm1081_vm2 = vweird.f32 %v1628_v48 }
 0x14f   : > { %v851_v28 = vadd.f32 %v2259_v12, %v805_v22  ;;  %vm1082_vm4 = vmor %vm1080_vm3, %vm1081_vm2  ;;  %v1099_v26 = vand.u32 2147483647, %v2397_v55  ;;  %vm1095_vm7 = vweird.f32 %v2397_v55 }
 0x150   : > { %1282 = vst [vmem:[%s2278_s21 + $0x38] sm:$0xff] %v1262_v43  ;;  %v886_v17 = vsub.f32 0.0, %v858_v16  ;;  %v1077_v15 = vsub.f32 1.0, %v1076_v0  ;;  %v809_v16 = vadd.f32 %v2392_v10, %v513_v8 }
 0x151   : > { %v595_v35 = vpop.f32.mrf.mxu3  ;;  %vm1100_vm9 = vcmp.eq.f32.partialorder %v1099_v26, 8.507059e+37 }
 0x152   : > { %v1630_v14 = vpop.eup %1629  ;;  %v596_v63 = vadd.f32 %v595_v35, %v2084_v42  ;;  %v917_v52 = vmul.f32 1.442695, %v886_v17  ;;  %v1078_v57 = vmul.f32 %v1628_v48, %v1077_v15  ;;  %v2415_v42 = vpop.f32.mrf.mxu0 }
 0x153   : > { %v2410_v5 = vadd.f32 1.0, %v1630_v14  ;;  %v1632_v30 = vpop.eup %1631 }
 0x154   : > { %v814_v60 = vadd.f32 %v765_v40, %v596_v63  ;;  %v1079_v34 = vadd.f32 %v1628_v48, %v1078_v57  ;;  %v1091_v21 = vmul.f32 %v1632_v30, %v2397_v55  ;;  %vm1096_vm6 = vweird.f32 %v1632_v30  ;;  %v518_v40 = vpop.f32.mrf.mxu2 }
 0x155   : > { %1633 = vrcp.f32 %v2410_v5  ;;  %v768_v51 = vpop.f32.mrf.mxu1  ;;  %vm1097_vm8 = vmor %vm1095_vm7, %vm1096_vm6  ;;  %v1114_v0 = vand.u32 2147483647, %v2410_v5  ;;  %v1116_v17 = vand.u32 2147483648, %v2410_v5  ;;  %vm1110_vm11 = vweird.f32 %v2410_v5 }
 0x156   : > { %1635 = vpow2.f32 %v917_v52  ;;  %v860_v3 = vadd.f32 %v2212_v13, %v814_v60  ;;  %v1083_v59 = vsel %vm1082_vm4, %v1628_v48, %v1079_v34  ;;  %v1092_v7 = vsub.f32 1.0, %v1091_v21 }
 0x157   : > { %v1088_v19 = vsel %vm1085_vm5, %v1087_v23, %v1083_v59  ;;  %v1117_v52 = vor.u32 1.1754944e-38, %v1116_v17  ;;  %v516_v57 = vadd.f32 %v2404_v27, %v2066_v37  ;;  %vm1115_vm13 = vcmp.eq.f32.partialorder %v1114_v0, 8.507059e+37 }
 0x158   : > { %v887_v9 = vsub.f32 0.0, %v860_v3  ;;  %v1263_v56 = vmul.f32 %v1088_v19, %v851_v28  ;;  %v1093_v11 = vmul.f32 %v1632_v30, %v1092_v7  ;;  %v519_v39 = vadd.f32 %v518_v40, %v2082_v41 }
 0x159   : > { %v598_v36 = vpop.f32.mrf.mxu3  ;;  %v811_v37 = vadd.f32 %v2415_v42, %v516_v57 }
 0x15a   : > { %v919_v18 = vmul.f32 1.442695, %v887_v9  ;;  %v599_v61 = vadd.f32 %v598_v36, %v2100_v46  ;;  %1283 = vst [vmem:[%s2278_s21 + $0x40] sm:$0xff] %v1263_v56  ;;  %v1094_v24 = vadd.f32 %v1632_v30, %v1093_v11  ;;  %v1102_v46 = vor.u32 1.1754944e-38, %v1101_v44  ;;  %v688_v14 = vpop.f32.mrf.mxu0 }
 0x15b   : > { %v1634_v4 = vpop.eup %1633  ;;  %v857_v42 = vadd.f32 %v2259_v12, %v811_v37  ;;  %v813_v41 = vadd.f32 %v688_v14, %v519_v39 }
 0x15c   : > { %v1636_v47 = vpop.eup %1635  ;;  %v1106_v31 = vmul.f32 %v1634_v4, %v2410_v5  ;;  %1637 = vpow2.f32 %v919_v18  ;;  %v816_v29 = vadd.f32 %v768_v51, %v599_v61  ;;  %v1098_v43 = vsel %vm1097_vm8, %v1632_v30, %v1094_v24  ;;  %v521_v59 = vpop.f32.mrf.mxu2 }
 0x15d   : > { %v2430_v33 = vadd.f32 1.0, %v1636_v47  ;;  %v771_v38 = vpop.f32.mrf.mxu1  ;;  %v1103_v35 = vsel %vm1100_vm9, %v1102_v46, %v1098_v43  ;;  %vm1111_vm10 = vweird.f32 %v1634_v4  ;;  %v855_v51 = vadd.f32 %v2259_v12, %v809_v16 }
 0x15e   : > { %v1107_v48 = vsub.f32 1.0, %v1106_v31  ;;  %v862_v22 = vadd.f32 %v2212_v13, %v816_v29  ;;  %v1264_v15 = vmul.f32 %v1103_v35, %v853_v32  ;;  %vm1112_vm12 = vmor %vm1110_vm11, %vm1111_vm10 }
 0x15f   : > { %1639 = vrcp.f32 %v2430_v33  ;;  %v1129_v9 = vand.u32 2147483647, %v2430_v33  ;;  %v1131_v19 = vand.u32 2147483648, %v2430_v33  ;;  %vm1125_vm15 = vweird.f32 %v2430_v33 }
 0x160   : > { %v1108_v55 = vmul.f32 %v1634_v4, %v1107_v48  ;;  %v888_v10 = vsub.f32 0.0, %v862_v22  ;;  %1284 = vst [vmem:[%s2278_s21 + $0x48] sm:$0xff] %v1264_v15 }
 0x161   : > { %v601_v63 = vpop.f32.mrf.mxu3  ;;  %vm1130_vm1 = vcmp.eq.f32.partialorder %v1129_v9, 8.507059e+37  ;;  %v1132_v47 = vor.u32 1.1754944e-38, %v1131_v19 }
 0x162   : > { %v1638_v25 = vpop.eup %1637  ;;  %v1109_v20 = vadd.f32 %v1634_v4, %v1108_v55  ;;  %v602_v60 = vadd.f32 %v601_v63, %v2116_v50  ;;  %v921_v34 = vmul.f32 1.442695, %v888_v10  ;;  %v691_v36 = vpop.f32.mrf.mxu0  ;;  %v859_v63 = vadd.f32 %v2259_v12, %v813_v41 }
 0x163   : > { %v2441_v1 = vadd.f32 1.0, %v1638_v25 }
 0x164   : > { %v1113_v30 = vsel %vm1112_vm12, %v1634_v4, %v1109_v20  ;;  %v818_v27 = vadd.f32 %v771_v38, %v602_v60  ;;  %v524_v0 = vpop.f32.mrf.mxu2 }
 0x165   : > { %v1640_v3 = vpop.eup %1639  ;;  %v1118_v28 = vsel %vm1115_vm13, %v1117_v52, %v1113_v30  ;;  %1641 = vrcp.f32 %v2441_v1  ;;  %v774_v5 = vpop.f32.mrf.mxu1  ;;  %v1144_v29 = vand.u32 2147483647, %v2441_v1  ;;  %v1146_v16 = vand.u32 2147483648, %v2441_v1 }
 0x166   : > { %v1265_v23 = vmul.f32 %v1118_v28, %v855_v51  ;;  %v1121_v21 = vmul.f32 %v1640_v3, %v2430_v33  ;;  %1643 = vpow2.f32 %v921_v34  ;;  %v864_v7 = vadd.f32 %v2212_v13, %v818_v27 }
 0x167   : > { %vm1126_vm14 = vweird.f32 %v1640_v3  ;;  %vm1140_vm3 = vweird.f32 %v2441_v1  ;;  %v1147_v22 = vor.u32 1.1754944e-38, %v1146_v16  ;;  %vm1145_vm5 = vcmp.eq.f32.partialorder %v1144_v29, 8.507059e+37 }
 0x168   : > { %1285 = vst [vmem:[%s2278_s21 + $0x50] sm:$0xff] %v1265_v23  ;;  %v1122_v50 = vsub.f32 1.0, %v1121_v21  ;;  %v889_v18 = vsub.f32 0.0, %v864_v7  ;;  %vm1127_vm0 = vmor %vm1125_vm15, %vm1126_vm14 }
 0x169   : > { %v604_v26 = vpop.f32.mrf.mxu3 }
 0x16a   : > { %v1123_v8 = vmul.f32 %v1640_v3, %v1122_v50  ;;  %v605_v56 = vadd.f32 %v604_v26, %v2132_v54  ;;  %v923_v32 = vmul.f32 1.442695, %v889_v18  ;;  %v694_v20 = vpop.f32.mrf.mxu0 }
 0x16b   : > { %v1642_v44 = vpop.eup %1641 }
 0x16c   : > { %v1124_v61 = vadd.f32 %v1640_v3, %v1123_v8  ;;  %v1136_v4 = vmul.f32 %v1642_v44, %v2441_v1  ;;  %v1644_v11 = vpop.eup %1643  ;;  %v820_v31 = vadd.f32 %v774_v5, %v605_v56  ;;  %1645 = vpow2.f32 %v923_v32  ;;  %v527_v27 = vpop.f32.mrf.mxu2 }
 0x16d   : > { %v777_v40 = vpop.f32.mrf.mxu1  ;;  %v948_v38 = vadd.f32 1.0, %v1644_v11  ;;  %vm1141_vm2 = vweird.f32 %v1642_v44  ;;  %v522_v1 = vadd.f32 %v521_v59, %v2098_v45  ;;  %v528_v16 = vadd.f32 %v527_v27, %v2130_v53 }
 0x16e   : > { %v1128_v24 = vsel %vm1127_vm0, %v1640_v3, %v1124_v61  ;;  %v1137_v54 = vsub.f32 1.0, %v1136_v4  ;;  %v866_v33 = vadd.f32 %v2212_v13, %v820_v31  ;;  %vm1142_vm4 = vmor %vm1140_vm3, %vm1141_vm2 }
 0x16f   : > { %v1133_v46 = vsel %vm1130_vm1, %v1132_v47, %v1128_v24  ;;  %1647 = vrcp.f32 %v948_v38  ;;  %v815_v21 = vadd.f32 %v691_v36, %v522_v1  ;;  %v1161_v37 = vand.u32 2147483648, %v948_v38 }
 0x170   : > { %v1266_v48 = vmul.f32 %v1133_v46, %v857_v42  ;;  %v1138_v43 = vmul.f32 %v1642_v44, %v1137_v54  ;;  %v890_v17 = vsub.f32 0.0, %v866_v33  ;;  %v1159_v19 = vand.u32 2147483647, %v948_v38 }
 0x171   : > { %v607_v35 = vpop.f32.mrf.mxu3  ;;  %vm1155_vm7 = vweird.f32 %v948_v38  ;;  %v1162_v56 = vor.u32 1.1754944e-38, %v1161_v37  ;;  %v525_v36 = vadd.f32 %v524_v0, %v2114_v49 }
 0x172   : > { %1286 = vst [vmem:[%s2278_s21 + $0x58] sm:$0xff] %v1266_v48  ;;  %v1139_v55 = vadd.f32 %v1642_v44, %v1138_v43  ;;  %v608_v14 = vadd.f32 %v607_v35, %v2148_v58  ;;  %v925_v15 = vmul.f32 1.442695, %v890_v17  ;;  %v1646_v52 = vpop.eup %1645  ;;  %vm1160_vm9 = vcmp.eq.f32.partialorder %v1159_v19, 8.507059e+37 }
 0x173   : > { %v949_v34 = vadd.f32 1.0, %v1646_v52  ;;  %v817_v31 = vadd.f32 %v694_v20, %v525_v36 }
 0x174   : > { %v1143_v25 = vsel %vm1142_vm4, %v1642_v44, %v1139_v55  ;;  %v822_v10 = vadd.f32 %v777_v40, %v608_v14  ;;  %1649 = vpow2.f32 %v925_v15  ;;  %v697_v44 = vpop.f32.mrf.mxu0  ;;  %v530_v33 = vpop.f32.mrf.mxu2 }
 0x175   : > { %v1148_v57 = vsel %vm1145_vm5, %v1147_v22, %v1143_v25  ;;  %v780_v60 = vpop.f32.mrf.mxu1  ;;  %v1648_v51 = vpop.eup %1647  ;;  %1651 = vrcp.f32 %v949_v34  ;;  %v1176_v40 = vand.u32 2147483648, %v949_v34  ;;  %vm1170_vm11 = vweird.f32 %v949_v34 }
 0x176   : > { %v1267_v30 = vmul.f32 %v1148_v57, %v859_v63  ;;  %v868_v58 = vadd.f32 %v2212_v13, %v822_v10  ;;  %v1151_v3 = vmul.f32 %v1648_v51, %v948_v38  ;;  %vm1156_vm6 = vweird.f32 %v1648_v51 }
 0x177   : > { %vm1157_vm8 = vmor %vm1155_vm7, %vm1156_vm6  ;;  %v1174_v38 = vand.u32 2147483647, %v949_v34  ;;  %v863_v55 = vadd.f32 %v2259_v12, %v817_v31  ;;  %v819_v15 = vadd.f32 %v697_v44, %v528_v16 }
 0x178   : > { %1287 = vst [vmem:[%s2278_s21 + $0x60] sm:$0xff] %v1267_v30  ;;  %v1152_v28 = vsub.f32 1.0, %v1151_v3  ;;  %v891_v5 = vsub.f32 0.0, %v868_v58 }
 0x179   : > { %v610_v23 = vpop.f32.mrf.mxu3  ;;  %vm1175_vm13 = vcmp.eq.f32.partialorder %v1174_v38, 8.507059e+37  ;;  %v865_v27 = vadd.f32 %v2259_v12, %v819_v15 }
 0x17a   : > { %v611_v50 = vadd.f32 %v610_v23, %v2164_v62  ;;  %v1650_v39 = vpop.eup %1649  ;;  %v1153_v9 = vmul.f32 %v1648_v51, %v1152_v28  ;;  %v927_v7 = vmul.f32 1.442695, %v891_v5  ;;  %v861_v62 = vadd.f32 %v2259_v12, %v815_v21  ;;  %v2556_v28 = vld [vmem:[#allocation5_spill] sm:$0xff] }
 0x17b   : > { %v2468_v45 = vadd.f32 1.0, %v1650_v39  ;;  %v1652_v8 = vpop.eup %1651  ;;  %v531_v5 = vadd.f32 %v530_v33, %v2556_v28 }
 0x17c   : > { %v824_v59 = vadd.f32 %v780_v60, %v611_v50  ;;  %v1154_v26 = vadd.f32 %v1648_v51, %v1153_v9  ;;  %1653 = vpow2.f32 %v927_v7  ;;  %v1166_v18 = vmul.f32 %v1652_v8, %v949_v34  ;;  %v700_v25 = vpop.f32.mrf.mxu0  ;;  %v533_v9 = vpop.f32.mrf.mxu2 }
 0x17d   : > { %1655 = vrcp.f32 %v2468_v45  ;;  %v783_v61 = vpop.f32.mrf.mxu1  ;;  %vm1171_vm10 = vweird.f32 %v1652_v8  ;;  %v1191_v63 = vand.u32 2147483648, %v2468_v45  ;;  %v1189_v57 = vand.u32 2147483647, %v2468_v45 }
 0x17e   : > { %v1158_v42 = vsel %vm1157_vm8, %v1648_v51, %v1154_v26  ;;  %v870_v4 = vadd.f32 %v2212_v13, %v824_v59  ;;  %v1167_v47 = vsub.f32 1.0, %v1166_v18  ;;  %vm1172_vm12 = vmor %vm1170_vm11, %vm1171_vm10  ;;  %vm1185_vm15 = vweird.f32 %v2468_v45 }
 0x17f   : > { %v1163_v41 = vsel %vm1160_vm9, %v1162_v56, %v1158_v42  ;;  %v1192_v3 = vor.u32 1.1754944e-38, %v1191_v63  ;;  %vm1190_vm1 = vcmp.eq.f32.partialorder %v1189_v57, 8.507059e+37  ;;  %v821_v26 = vadd.f32 %v700_v25, %v531_v5 }
 0x180   : > { %v1268_v11 = vmul.f32 %v1163_v41, %v861_v62  ;;  %v892_v24 = vsub.f32 0.0, %v870_v4  ;;  %v1168_v29 = vmul.f32 %v1652_v8, %v1167_v47 }
 0x181   : > { %v613_v32 = vpop.f32.mrf.mxu3  ;;  %v867_v41 = vadd.f32 %v2259_v12, %v821_v26 }
 0x182   : > { %v614_v49 = vadd.f32 %v613_v32, %v2180_v2  ;;  %v1654_v54 = vpop.eup %1653  ;;  %1288 = vst [vmem:[%s2278_s21 + $0x68] sm:$0xff] %v1268_v11  ;;  %v929_v43 = vmul.f32 1.442695, %v892_v24  ;;  %v1169_v17 = vadd.f32 %v1652_v8, %v1168_v29  ;;  %v1177_v2 = vor.u32 1.1754944e-38, %v1176_v40  ;;  %v2557_v40 = vld [vmem:[#allocation6_spill] sm:$0xff] }
 0x183   : > { %v1656_v46 = vpop.eup %1655  ;;  %v2477_v48 = vadd.f32 1.0, %v1654_v54  ;;  %v534_v24 = vadd.f32 %v533_v9, %v2557_v40 }
 0x184   : > { %v826_v0 = vadd.f32 %v783_v61, %v614_v49  ;;  %v1181_v35 = vmul.f32 %v1656_v46, %v2468_v45  ;;  %v1173_v14 = vsel %vm1172_vm12, %v1652_v8, %v1169_v17  ;;  %vm1186_vm14 = vweird.f32 %v1656_v46  ;;  %v703_v62 = vpop.f32.mrf.mxu0  ;;  %v536_v54 = vpop.f32.mrf.mxu2 }
 0x185   : > { %1657 = vrcp.f32 %v2477_v48  ;;  %v1178_v53 = vsel %vm1175_vm13, %v1177_v2, %v1173_v14  ;;  %v786_v51 = vpop.f32.mrf.mxu1  ;;  %vm1187_vm0 = vmor %vm1185_vm15, %vm1186_vm14  ;;  %v1206_v8 = vand.u32 2147483648, %v2477_v48  ;;  %v1204_v36 = vand.u32 2147483647, %v2477_v48  ;;  %v2558_v2 = vld [vmem:[#allocation7_spill] sm:$0xff] }
 0x186   : > { %v1182_v22 = vsub.f32 1.0, %v1181_v35  ;;  %1659 = vpow2.f32 %v929_v43  ;;  %v872_v20 = vadd.f32 %v2212_v13, %v826_v0  ;;  %v1269_v10 = vmul.f32 %v1178_v53, %v863_v55 }
 0x187   : > { %vm1200_vm3 = vweird.f32 %v2477_v48  ;;  %vm1205_vm5 = vcmp.eq.f32.partialorder %v1204_v36, 8.507059e+37  ;;  %v823_v16 = vadd.f32 %v703_v62, %v534_v24  ;;  %v537_v14 = vadd.f32 %v536_v54, %v2558_v2 }
 0x188   : > { %v1183_v52 = vmul.f32 %v1656_v46, %v1182_v22  ;;  %v893_v30 = vsub.f32 0.0, %v872_v20  ;;  %1289 = vst [vmem:[%s2278_s21 + $0x70] sm:$0xff] %v1269_v10 }
 0x189   : > { %v616_v60 = vpop.f32.mrf.mxu3  ;;  %v869_v53 = vadd.f32 %v2259_v12, %v823_v16 }
 0x18a   : > { %v617_v1 = vadd.f32 %v616_v60, %v2196_v6  ;;  %v1184_v34 = vadd.f32 %v1656_v46, %v1183_v52  ;;  %v931_v23 = vmul.f32 1.442695, %v893_v30 }
 0x18b   : > { %v1658_v58 = vpop.eup %1657 }
 0x18c   : > { %v828_v21 = vadd.f32 %v786_v51, %v617_v1  ;;  %v1660_v37 = vpop.eup %1659  ;;  %v1188_v50 = vsel %vm1187_vm0, %v1656_v46, %v1184_v34  ;;  %v1196_v39 = vmul.f32 %v1658_v58, %v2477_v48  ;;  %1661 = vpow2.f32 %v931_v23  ;;  %v706_v43 = vpop.f32.mrf.mxu0 }
 0x18d   : > { %v1193_v6 = vsel %vm1190_vm1, %v1192_v3, %v1188_v50  ;;  %v952_v19 = vadd.f32 1.0, %v1660_v37  ;;  %vm1201_vm2 = vweird.f32 %v1658_v58  ;;  %v825_v52 = vadd.f32 %v706_v43, %v537_v14  ;;  %v539_v51 = vpop.f32.mrf.mxu2 }
 0x18e   : > { %v1270_v7 = vmul.f32 %v1193_v6, %v865_v27  ;;  %v1197_v45 = vsub.f32 1.0, %v1196_v39  ;;  %v874_v59 = vadd.f32 %v2212_v13, %v828_v21  ;;  %vm1202_vm4 = vmor %vm1200_vm3, %vm1201_vm2  ;;  %v1207_v13 = vor.u32 1.1754944e-38, %v1206_v8 }
 0x18f   : > { %1663 = vrcp.f32 %v952_v19  ;;  %v1221_v38 = vand.u32 2147483648, %v952_v19  ;;  %v1219_v48 = vand.u32 2147483647, %v952_v19  ;;  %vm1215_vm7 = vweird.f32 %v952_v19 }
 0x190   : > { %1290 = vst [vmem:[%s2278_s21 + $0x78] sm:$0xff] %v1270_v7  ;;  %v1198_v56 = vmul.f32 %v1658_v58, %v1197_v45  ;;  %v894_v44 = vsub.f32 0.0, %v874_v59  ;;  %v871_v5 = vadd.f32 %v2259_v12, %v825_v52 }
 0x191   : > { %v1222_v55 = vor.u32 1.1754944e-38, %v1221_v38  ;;  %vm1220_vm9 = vcmp.eq.f32.partialorder %v1219_v48, 8.507059e+37 }
 0x192   : > { %v1199_v42 = vadd.f32 %v1658_v58, %v1198_v56  ;;  %v933_v18 = vmul.f32 1.442695, %v894_v44  ;;  %v1662_v61 = vpop.eup %1661 }
 0x193   : > { %v953_v11 = vadd.f32 1.0, %v1662_v61 }
 0x194   : > { %v1203_v4 = vsel %vm1202_vm4, %v1658_v58, %v1199_v42  ;;  %1665 = vpow2.f32 %v933_v18  ;;  %v2559_v58 = vld [vmem:[#allocation8_spill] sm:$0xff]  ;;  %v709_v21 = vpop.f32.mrf.mxu0 }
 0x195   : > { %v1664_v47 = vpop.eup %1663  ;;  %v1208_v32 = vsel %vm1205_vm5, %v1207_v13, %v1203_v4  ;;  %1667 = vrcp.f32 %v953_v11  ;;  %v1236_v10 = vand.u32 2147483648, %v953_v11  ;;  %v1234_v60 = vand.u32 2147483647, %v953_v11 }
 0x196   : > { %v1271_v31 = vmul.f32 %v1208_v32, %v867_v41  ;;  %v1211_v49 = vmul.f32 %v1664_v47, %v952_v19  ;;  %vm1216_vm6 = vweird.f32 %v1664_v47  ;;  %vm1230_vm11 = vweird.f32 %v953_v11 }
 0x197   : > { %vm1217_vm8 = vmor %vm1215_vm7, %vm1216_vm6  ;;  %v1237_v34 = vor.u32 1.1754944e-38, %v1236_v10  ;;  %v540_v3 = vadd.f32 %v539_v51, %v2559_v58  ;;  %vm1235_vm13 = vcmp.eq.f32.partialorder %v1234_v60, 8.507059e+37 }
 0x198   : > { %1291 = vst [vmem:[%s2278_s21 + $0x80] sm:$0xff] %v1271_v31  ;;  %v1212_v29 = vsub.f32 1.0, %v1211_v49 }
 0x199   : > { %v827_v6 = vadd.f32 %v709_v21, %v540_v3 }
 0x19a   : > { %v1666_v46 = vpop.eup %1665  ;;  %v1213_v33 = vmul.f32 %v1664_v47, %v1212_v29 }
 0x19b   : > { %v954_v0 = vadd.f32 1.0, %v1666_v46  ;;  %v1668_v17 = vpop.eup %1667  ;;  %v873_v59 = vadd.f32 %v2259_v12, %v827_v6 }
 0x19c   : > { %v1214_v35 = vadd.f32 %v1664_v47, %v1213_v33  ;;  %v1226_v22 = vmul.f32 %v1668_v17, %v953_v11  ;;  %vm1231_vm10 = vweird.f32 %v1668_v17 }
 0x19d   : > { %1669 = vrcp.f32 %v954_v0  ;;  %vm1232_vm12 = vmor %vm1230_vm11, %vm1231_vm10  ;;  %v1251_v39 = vand.u32 2147483648, %v954_v0  ;;  %v1249_v19 = vand.u32 2147483647, %v954_v0  ;;  %vm1245_vm15 = vweird.f32 %v954_v0 }
 0x19e   : > { %v1218_v15 = vsel %vm1217_vm8, %v1664_v47, %v1214_v35  ;;  %v1227_v25 = vsub.f32 1.0, %v1226_v22 }
 0x19f   : > { %v1223_v63 = vsel %vm1220_vm9, %v1222_v55, %v1218_v15  ;;  %v1252_v45 = vor.u32 1.1754944e-38, %v1251_v39  ;;  %vm1250_vm1 = vcmp.eq.f32.partialorder %v1249_v19, 8.507059e+37 }
 0x1a0   : > { %v1272_v20 = vmul.f32 %v1223_v63, %v869_v53  ;;  %v1228_v57 = vmul.f32 %v1668_v17, %v1227_v25 }
 0x1a2   : > { %1292 = vst [vmem:[%s2278_s21 + $0x88] sm:$0xff] %v1272_v20  ;;  %v1229_v1 = vadd.f32 %v1668_v17, %v1228_v57 }
 0x1a3   : > { %v1670_v30 = vpop.eup %1669 }
 0x1a4   : > { %v1241_v28 = vmul.f32 %v1670_v30, %v954_v0  ;;  %v1233_v23 = vsel %vm1232_vm12, %v1668_v17, %v1229_v1  ;;  %vm1246_vm14 = vweird.f32 %v1670_v30 }
 0x1a5   : > { %v1238_v37 = vsel %vm1235_vm13, %v1237_v34, %v1233_v23  ;;  %vm1247_vm0 = vmor %vm1245_vm15, %vm1246_vm14 }
 0x1a6   : > { %v1242_v27 = vsub.f32 1.0, %v1241_v28  ;;  %v1273_v50 = vmul.f32 %v1238_v37, %v871_v5 }
 0x1a8   : > { %v1243_v9 = vmul.f32 %v1670_v30, %v1242_v27  ;;  %1293 = vst [vmem:[%s2278_s21 + $0x90] sm:$0xff] %v1273_v50 }
 0x1aa   : > { %v1244_v7 = vadd.f32 %v1670_v30, %v1243_v9 }
 0x1ac   : > { %v1248_v26 = vsel %vm1247_vm0, %v1670_v30, %v1244_v7 }
 0x1ad   : > { %v1253_v8 = vsel %vm1250_vm1, %v1252_v45, %v1248_v26 }
 0x1ae   : > { %v1274_v56 = vmul.f32 %v1253_v8, %v873_v59 }
 0x1b0   : > { %1294 = vst [vmem:[%s2278_s21 + $0x98] sm:$0xff] %v1274_v56 }
 0x1b1   : > { %1698 = shalt.err (!%p1695_p5)
}
 0x1b2   : > { %s1751_s11 = smov 128   ;;  %s1752_s18 = smov 8  }
 0x1b3   : > { %1534 = dma.vmem_to_hbm [thread:$0]  (%p1813_p4), %s1311_s15, 2560, %s1313_s29, %s1296_s30, %s1751_s11, %s1751_s11, %s1752_s18  }
 0x1b4 PF: > { %p1540_p6 = scmp.ge.s32.totalorder %s1749_s17, 2  ;;  %s1327_s19 = sand.u32 1, %s1729_s12  }
 0x1b5   : > { %s1328_s21 = scalar_lea.sflag [#allocation3], %s1327_s19 }
 0x1b6   : > { %p1537_p7 = pnand %p1540_p6, %p1820_p8 }
 0x1b8   : > { %p1538_p9 = pneg %p1537_p7 }
 0x1ba   : > { %1724 = dma.done.wait (%p1538_p9), %s1328_s21, 2560  }
 0x1bb   : > { %1726 = vsyncadd (%p1538_p9), %s1328_s21, 4294964736  ;;  %s16_s17 = sadd.s32 1, %s1749_s17   ;;  %s2560_s12 = smov %s1733_s13 }
 0x1bc   : > { %p13_p10 = scmp.ge.s32.totalorder %s16_s17, 4   ;;  %s2561_s13 = smov %s1737_s14 }
 0x1bd   : > { %s2562_s14 = smov %s1826_s25  ;;  %s2563_s15 = smov %s1745_s16 }
 0x1be   : > { %s2564_s16 = smov %s2566_s20  ;;  %15 = sbr.rel (!%p13_p10) target bundleno = 4 (0x4), region = 69 }
 0x1c3   :  { %1334 = vsyncpa [#allocation3], 1 }
 0x1c4   :  { %1336 = vsyncpa [#allocation3 + $0x1], 1 }

</bundles_post_ra>
